<compile_context>
chip_gen: v7x
topology: tpu7x:2x2x1
jax: 0.10.0
libtpu: 0.0.40
codegen_flags: <defaults>
</compile_context>

<pallas_src>
import functools
import math

import jax
import jax.numpy as jnp
from jax.experimental import pallas as pl
from jax.experimental.pallas import tpu as pltpu

INPUT_CHANNELS = 3
HIDDEN = [64, 64]            # channels=[64, 64]
TIME_CHANNELS = 64           # time_channels=64
HALF_T = TIME_CHANNELS // 2
DEFAULT_BLOCK_BATCH = 8192   # lane-dim tile (128-aligned); a few MiB of VMEM per step


def _net_kernel(xt_ref, wfour_ref,
                w1_ref, e1_ref, b1_ref,
                w2_ref, e2_ref, b2_ref,
                wf_ref, bf_ref,
                out_ref, *, compute_dtype):
    xt = xt_ref[...]                     # (4, TB) f32: rows 0..2 = x^T, row 3 = t
    t = xt[3:4, :]                       # (1, TB)  time row
    wfour = wfour_ref[...]               # (32, 1)  f32 deterministic Fourier freqs

    # GaussianFourierProjection, kept in f32 (sin/cos on the EUP, lane-dense).
    proj = wfour * t                                                  # (32, TB)
    feat = jnp.concatenate([jnp.sin(proj), jnp.cos(proj)], axis=0)    # (64, TB)
    feat_c = feat.astype(compute_dtype)

    def mm(w_ref, a):
        # Pre-cast weight (bf16 or f32) @ activation, f32 accumulation on the MXU.
        return jnp.dot(w_ref[...], a, preferred_element_type=jnp.float32)

    def silu(v):
        # sigmoid(v) = 0.5*tanh(0.5*v) + 0.5 : a single EUP op per element
        return v * (0.5 * jnp.tanh(0.5 * v) + 0.5)

    # ConditionalLinear 1: w1 is zero-padded over the fused t row, so the whole
    # (4, TB) slab multiplies cleanly (no in-kernel slice/concat for x).
    h = silu(mm(w1_ref, xt.astype(compute_dtype)) + mm(e1_ref, feat_c) + b1_ref[...])
    # ConditionalLinear 2
    h = silu(mm(w2_ref, h.astype(compute_dtype)) + mm(e2_ref, feat_c) + b2_ref[...])
    # Final Linear(64 -> 3)
    out = mm(wf_ref, h.astype(compute_dtype)) + bf_ref[...]           # (3, TB)
    out_ref[...] = out.astype(out_ref.dtype)


def _pick_tile(batch, block_batch, min_steps=4):
    """Lane-dim batch tile: 128-aligned, and capped so the grid keeps at least
    `min_steps` steps (v7x megacore sharding + DMA/compute overlap) when the
    batch is large enough."""
    tb = min(block_batch, batch)
    if batch >= min_steps * 128:
        tb = min(tb, -(-batch // min_steps))
    if tb < batch:
        tb = max(128, (tb // 128) * 128)
    return tb


def net_forward(x, t, params, *, block_batch=DEFAULT_BLOCK_BATCH, use_bf16=True):
    """x: (B, 3) float32, t: (B,) float32 -> (B, 3) float32"""
    B = x.shape[0]
    compute_dtype = jnp.bfloat16 if use_bf16 else jnp.float32

    # Batch-minor (lane-dense) layout: x^T and t fused into one (4, B) slab.
    xt = jnp.concatenate(
        [x.astype(jnp.float32).T, t.reshape(1, B).astype(jnp.float32)], axis=0)

    # Pre-cast weights to the MXU operand dtype outside the kernel (one tiny XLA
    # op on ~20 KB of data): halves weight DMA bytes and removes per-grid-step
    # VPU casts.  Biases stay f32.
    wc = lambda a: a.astype(compute_dtype)
    w1pad, e1, w2, e2, wf = (wc(params[k]) for k in ("w1pad", "e1", "w2", "e2", "wf"))
    b1, b2, bf = params["b1"], params["b2"], params["bf"]
    wfour = params["wfour_col"]

    tb = _pick_tile(B, block_batch)
    grid = (pl.cdiv(B, tb),)

    kernel = functools.partial(_net_kernel, compute_dtype=compute_dtype)

    def act_spec(rows):
        # batch-tiled activation block (lane dim = batch), pipelined across the grid
        return pl.BlockSpec((rows, tb), lambda i: (0, i))

    def const_spec(arr):
        # VMEM-resident parameter: same block for every grid step (no re-DMA)
        shape = arr.shape
        return pl.BlockSpec(shape, lambda i: (0,) * len(shape))

    out_t = pl.pallas_call(
        kernel,
        out_shape=jax.ShapeDtypeStruct((INPUT_CHANNELS, B), jnp.float32),
        grid=grid,
        in_specs=[
            act_spec(INPUT_CHANNELS + 1),   # fused (x | t) slab, (4, TB)
            const_spec(wfour),              # (32, 1)
            const_spec(w1pad),              # (64, 4)
            const_spec(e1),                 # (64, 64)
            const_spec(b1),                 # (64, 1)
            const_spec(w2),                 # (64, 64)
            const_spec(e2),                 # (64, 64)
            const_spec(b2),                 # (64, 1)
            const_spec(wf),                 # (3, 64)
            const_spec(bf),                 # (3, 1)
        ],
        out_specs=act_spec(INPUT_CHANNELS),
        compiler_params=pltpu.CompilerParams(
            dimension_semantics=("parallel",)),   # shard batch axis on v7x's 2 TCs
    )(xt, wfour, w1pad, e1, b1, w2, e2, b2, wf, bf)

    return out_t.T   # back to (B, 3); wrapper-side layout plumbing only


def init_params(key):
    """Deterministic init mirroring torch.nn.Linear (weight (out,in), uniform
    +/- 1/sqrt(fan_in)).  One-time kernel param prep here (not per forward):
    (out,in) orientation for W @ X, zero-padded layer-1 weight over the fused
    t row, and pre-summed ConditionalLinear biases."""
    def linear(k, fan_in, fan_out):
        kw, kb = jax.random.split(k)
        bound = 1.0 / math.sqrt(fan_in)
        w = jax.random.uniform(kw, (fan_out, fan_in), jnp.float32, -bound, bound)
        b = jax.random.uniform(kb, (fan_out,), jnp.float32, -bound, bound)
        return w, b

    k1, k2, k3, k4, k5 = jax.random.split(key, 5)
    w1, b1 = linear(k1, INPUT_CHANNELS, HIDDEN[0])     # layer-1 linear
    e1, eb1 = linear(k2, TIME_CHANNELS, HIDDEN[0])     # layer-1 time-embed linear
    w2, b2 = linear(k3, HIDDEN[0], HIDDEN[1])          # layer-2 linear
    e2, eb2 = linear(k4, TIME_CHANNELS, HIDDEN[1])     # layer-2 time-embed linear
    wf, bf = linear(k5, HIDDEN[1], INPUT_CHANNELS)     # final linear

    # GaussianFourierProjection "W" — deterministic: exp(arange(d/2)*log(1e4)/(d/2))
    # exactly as the module defines it.
    # TODO(synk): verify this buffer (sign / 2*pi convention) against any trained
    # PyTorch checkpoint that gets loaded.
    scale = math.log(10000.0) / HALF_T
    wfour = jnp.exp(jnp.arange(HALF_T, dtype=jnp.float32) * scale)

    # Zero-pad w1 along K (3 -> 4) so the fused (x|t) slab multiplies directly;
    # the zero column annihilates the t row.
    w1pad = jnp.concatenate([w1, jnp.zeros((HIDDEN[0], 1), jnp.float32)], axis=1)

    return dict(
        # kernel-ready (batch-minor, W @ X orientation)
        wfour_col=wfour.reshape(HALF_T, 1),            # (32, 1)
        w1pad=w1pad,                                   # (64, 4)
        e1=e1,                                         # (64, 64)
        b1=(b1 + eb1).reshape(HIDDEN[0], 1),           # (64, 1) pre-summed
        w2=w2, e2=e2,                                  # (64, 64) each
        b2=(b2 + eb2).reshape(HIDDEN[1], 1),           # (64, 1) pre-summed
        wf=wf,                                         # (3, 64)
        bf=bf.reshape(INPUT_CHANNELS, 1),              # (3, 1)
        # unfused torch-layout copies for the pure-JAX reference
        _w1=w1, _b1=b1, _e1=e1, _eb1=eb1,
        _w2=w2, _b2=b2, _e2=e2, _eb2=eb2,
        _wf=wf, _bf=bf, _wfour=wfour,
    )


def net_forward_ref(x, t, p):
    """Pure-JAX reference (unfused weights, full f32, exp-based sigmoid)."""
    proj = t.reshape(-1, 1) * p["_wfour"][None, :]
    feat = jnp.concatenate([jnp.sin(proj), jnp.cos(proj)], axis=-1)
    silu = lambda v: v * jax.nn.sigmoid(v)
    h = silu(x @ p["_w1"].T + p["_b1"] + feat @ p["_e1"].T + p["_eb1"])
    h = silu(h @ p["_w2"].T + p["_b2"] + feat @ p["_e2"].T + p["_eb2"])
    return h @ p["_wf"].T + p["_bf"]


if __name__ == "__main__":
    key = jax.random.PRNGKey(0)
    kx, kt, kp = jax.random.split(key, 3)

    B = 512
    x = jax.random.normal(kx, (B, INPUT_CHANNELS), jnp.float32)
    t = jax.random.uniform(kt, (B,), jnp.float32)
    params = init_params(kp)

    ref = net_forward_ref(x, t, params)

    # Exact-f32 path: tight check against the pure-JAX reference
    # (tile picker gives tb=128 -> 4 grid steps over B=512).
    out_f32 = jax.block_until_ready(net_forward(x, t, params, use_bf16=False))
    assert out_f32.shape == (B, INPUT_CHANNELS)
    assert jnp.allclose(out_f32, ref, atol=1e-4, rtol=1e-4), \
        "f32 kernel mismatch vs pure-JAX reference"

    # Default path: bf16 MXU operands, f32 accumulation + f32 elementwise.
    # (x itself is a bf16 operand -> ~3 significant digits; fine for diffusion
    #  score nets, hence the looser tolerance.)
    out_bf16 = jax.block_until_ready(net_forward(x, t, params, use_bf16=True))
    assert out_bf16.shape == (B, INPUT_CHANNELS)
    assert jnp.allclose(out_bf16, ref, atol=5e-2, rtol=5e-2), \
        "bf16 kernel mismatch vs pure-JAX reference"

    print("KERNEL_OK")
</pallas_src>

<mosaic_0001>
module attributes {stable_mosaic.version = 11 : i64} {
  func.func @_net_kernel(%arg0: i32, %arg1: memref<4x128xf32, #tpu.memory_space<vmem>>, %arg2: memref<32x1xf32, #tpu.memory_space<vmem>>, %arg3: memref<64x4xf32, #tpu.memory_space<vmem>>, %arg4: memref<64x64xf32, #tpu.memory_space<vmem>>, %arg5: memref<64x1xf32, #tpu.memory_space<vmem>>, %arg6: memref<64x64xf32, #tpu.memory_space<vmem>>, %arg7: memref<64x64xf32, #tpu.memory_space<vmem>>, %arg8: memref<64x1xf32, #tpu.memory_space<vmem>>, %arg9: memref<3x64xf32, #tpu.memory_space<vmem>>, %arg10: memref<3x1xf32, #tpu.memory_space<vmem>>, %arg11: memref<3x128xf32, #tpu.memory_space<vmem>>) attributes {dimension_semantics = [#tpu.dimension_semantics<parallel>], iteration_bounds = array<i64: 4>, scalar_prefetch = 0 : i64, scratch_operands = 0 : i64, tpu.core_type = #tpu.core_type<tc>, window_params = [{transform_indices = @transform_0, window_bounds = array<i64: 4, 128>}, {pipeline_mode = #tpu.pipeline_mode<synchronous>, transform_indices = @transform_1, window_bounds = array<i64: 32, 1>}, {pipeline_mode = #tpu.pipeline_mode<synchronous>, transform_indices = @transform_2, window_bounds = array<i64: 64, 4>}, {pipeline_mode = #tpu.pipeline_mode<synchronous>, transform_indices = @transform_3, window_bounds = array<i64: 64, 64>}, {pipeline_mode = #tpu.pipeline_mode<synchronous>, transform_indices = @transform_4, window_bounds = array<i64: 64, 1>}, {pipeline_mode = #tpu.pipeline_mode<synchronous>, transform_indices = @transform_5, window_bounds = array<i64: 64, 64>}, {pipeline_mode = #tpu.pipeline_mode<synchronous>, transform_indices = @transform_6, window_bounds = array<i64: 64, 64>}, {pipeline_mode = #tpu.pipeline_mode<synchronous>, transform_indices = @transform_7, window_bounds = array<i64: 64, 1>}, {pipeline_mode = #tpu.pipeline_mode<synchronous>, transform_indices = @transform_8, window_bounds = array<i64: 3, 64>}, {pipeline_mode = #tpu.pipeline_mode<synchronous>, transform_indices = @transform_9, window_bounds = array<i64: 3, 1>}, {transform_indices = @transform_10, window_bounds = array<i64: 3, 128>}]} {
    %c0 = arith.constant 0 : index
    %c0_0 = arith.constant 0 : index
    %0 = vector.load %arg1[%c0, %c0_0] : memref<4x128xf32, #tpu.memory_space<vmem>>, vector<4x128xf32>
    %1 = vector.extract_strided_slice %0 {offsets = [3, 0], sizes = [1, 128], strides = [1, 1]} : vector<4x128xf32> to vector<1x128xf32>
    %c0_1 = arith.constant 0 : index
    %c0_2 = arith.constant 0 : index
    %2 = vector.load %arg2[%c0_1, %c0_2] : memref<32x1xf32, #tpu.memory_space<vmem>>, vector<32x1xf32>
    %3 = vector.broadcast %2 : vector<32x1xf32> to vector<32x128xf32>
    %4 = vector.broadcast %1 : vector<1x128xf32> to vector<32x128xf32>
    %5 = arith.mulf %3, %4 : vector<32x128xf32>
    %6 = math.sin %5 : vector<32x128xf32>
    %7 = math.cos %5 : vector<32x128xf32>
    %8 = tpu.concatenate %6, %7 in 0 : vector<32x128xf32>, vector<32x128xf32> -> vector<64x128xf32>
    %c0_3 = arith.constant 0 : index
    %c0_4 = arith.constant 0 : index
    %9 = vector.load %arg3[%c0_3, %c0_4] : memref<64x4xf32, #tpu.memory_space<vmem>>, vector<64x4xf32>
    %cst = arith.constant dense<0.000000e+00> : vector<64x128xf32>
    %10 = tpu.matmul %9, %0, %cst {dimension_numbers = #tpu.dot_dimension_numbers<[1], [0], [0], [1], [0, 0, 1, 1], [], []>} : vector<64x4xf32>, vector<4x128xf32>, vector<64x128xf32> -> vector<64x128xf32>
    %c0_5 = arith.constant 0 : index
    %c0_6 = arith.constant 0 : index
    %11 = vector.load %arg4[%c0_5, %c0_6] : memref<64x64xf32, #tpu.memory_space<vmem>>, vector<64x64xf32>
    %cst_7 = arith.constant dense<0.000000e+00> : vector<64x128xf32>
    %12 = tpu.matmul %11, %8, %cst_7 {dimension_numbers = #tpu.dot_dimension_numbers<[1], [0], [0], [1], [0, 0, 1, 1], [], []>} : vector<64x64xf32>, vector<64x128xf32>, vector<64x128xf32> -> vector<64x128xf32>
    %13 = arith.addf %10, %12 : vector<64x128xf32>
    %c0_8 = arith.constant 0 : index
    %c0_9 = arith.constant 0 : index
    %14 = vector.load %arg5[%c0_8, %c0_9] : memref<64x1xf32, #tpu.memory_space<vmem>>, vector<64x1xf32>
    %15 = vector.broadcast %14 : vector<64x1xf32> to vector<64x128xf32>
    %16 = arith.addf %13, %15 : vector<64x128xf32>
    %cst_10 = arith.constant 5.000000e-01 : f32
    %17 = vector.broadcast %cst_10 : f32 to vector<64x128xf32>
    %18 = arith.mulf %17, %16 : vector<64x128xf32>
    %19 = math.tanh %18 : vector<64x128xf32>
    %cst_11 = arith.constant 5.000000e-01 : f32
    %20 = vector.broadcast %cst_11 : f32 to vector<64x128xf32>
    %21 = arith.mulf %20, %19 : vector<64x128xf32>
    %cst_12 = arith.constant 5.000000e-01 : f32
    %22 = vector.broadcast %cst_12 : f32 to vector<64x128xf32>
    %23 = arith.addf %21, %22 : vector<64x128xf32>
    %24 = arith.mulf %16, %23 : vector<64x128xf32>
    %c0_13 = arith.constant 0 : index
    %c0_14 = arith.constant 0 : index
    %25 = vector.load %arg6[%c0_13, %c0_14] : memref<64x64xf32, #tpu.memory_space<vmem>>, vector<64x64xf32>
    %cst_15 = arith.constant dense<0.000000e+00> : vector<64x128xf32>
    %26 = tpu.matmul %25, %24, %cst_15 {dimension_numbers = #tpu.dot_dimension_numbers<[1], [0], [0], [1], [0, 0, 1, 1], [], []>} : vector<64x64xf32>, vector<64x128xf32>, vector<64x128xf32> -> vector<64x128xf32>
    %c0_16 = arith.constant 0 : index
    %c0_17 = arith.constant 0 : index
    %27 = vector.load %arg7[%c0_16, %c0_17] : memref<64x64xf32, #tpu.memory_space<vmem>>, vector<64x64xf32>
    %cst_18 = arith.constant dense<0.000000e+00> : vector<64x128xf32>
    %28 = tpu.matmul %27, %8, %cst_18 {dimension_numbers = #tpu.dot_dimension_numbers<[1], [0], [0], [1], [0, 0, 1, 1], [], []>} : vector<64x64xf32>, vector<64x128xf32>, vector<64x128xf32> -> vector<64x128xf32>
    %29 = arith.addf %26, %28 : vector<64x128xf32>
    %c0_19 = arith.constant 0 : index
    %c0_20 = arith.constant 0 : index
    %30 = vector.load %arg8[%c0_19, %c0_20] : memref<64x1xf32, #tpu.memory_space<vmem>>, vector<64x1xf32>
    %31 = vector.broadcast %30 : vector<64x1xf32> to vector<64x128xf32>
    %32 = arith.addf %29, %31 : vector<64x128xf32>
    %cst_21 = arith.constant 5.000000e-01 : f32
    %33 = vector.broadcast %cst_21 : f32 to vector<64x128xf32>
    %34 = arith.mulf %33, %32 : vector<64x128xf32>
    %35 = math.tanh %34 : vector<64x128xf32>
    %cst_22 = arith.constant 5.000000e-01 : f32
    %36 = vector.broadcast %cst_22 : f32 to vector<64x128xf32>
    %37 = arith.mulf %36, %35 : vector<64x128xf32>
    %cst_23 = arith.constant 5.000000e-01 : f32
    %38 = vector.broadcast %cst_23 : f32 to vector<64x128xf32>
    %39 = arith.addf %37, %38 : vector<64x128xf32>
    %40 = arith.mulf %32, %39 : vector<64x128xf32>
    %c0_24 = arith.constant 0 : index
    %c0_25 = arith.constant 0 : index
    %41 = vector.load %arg9[%c0_24, %c0_25] : memref<3x64xf32, #tpu.memory_space<vmem>>, vector<3x64xf32>
    %cst_26 = arith.constant dense<0.000000e+00> : vector<3x128xf32>
    %42 = tpu.matmul %41, %40, %cst_26 {dimension_numbers = #tpu.dot_dimension_numbers<[1], [0], [0], [1], [0, 0, 1, 1], [], []>} : vector<3x64xf32>, vector<64x128xf32>, vector<3x128xf32> -> vector<3x128xf32>
    %c0_27 = arith.constant 0 : index
    %c0_28 = arith.constant 0 : index
    %43 = vector.load %arg10[%c0_27, %c0_28] : memref<3x1xf32, #tpu.memory_space<vmem>>, vector<3x1xf32>
    %44 = vector.broadcast %43 : vector<3x1xf32> to vector<3x128xf32>
    %45 = arith.addf %42, %44 : vector<3x128xf32>
    %c0_29 = arith.constant 0 : index
    %c0_30 = arith.constant 0 : index
    %46 = vector.load %arg11[%c0_29, %c0_30] : memref<3x128xf32, #tpu.memory_space<vmem>>, vector<3x128xf32>
    tpu.vector_store %arg11[%c0_29, %c0_30], %45 {strides = array<i32>} : memref<3x128xf32, #tpu.memory_space<vmem>>, vector<3x128xf32>,
    return
  }
  func.func @transform_0(%arg0: i32) -> (i32, i32) {
    %c0_i32 = arith.constant 0 : i32
    %c0_i32_0 = arith.constant 0 : i32
    return %c0_i32, %arg0 : i32, i32
  }
  func.func @transform_1(%arg0: i32) -> (i32, i32) {
    %c0_i32 = arith.constant 0 : i32
    %c0_i32_0 = arith.constant 0 : i32
    %c0_i32_1 = arith.constant 0 : i32
    return %c0_i32, %c0_i32_0 : i32, i32
  }
  func.func @transform_2(%arg0: i32) -> (i32, i32) {
    %c0_i32 = arith.constant 0 : i32
    %c0_i32_0 = arith.constant 0 : i32
    %c0_i32_1 = arith.constant 0 : i32
    return %c0_i32, %c0_i32_0 : i32, i32
  }
  func.func @transform_3(%arg0: i32) -> (i32, i32) {
    %c0_i32 = arith.constant 0 : i32
    %c0_i32_0 = arith.constant 0 : i32
    %c0_i32_1 = arith.constant 0 : i32
    return %c0_i32, %c0_i32_0 : i32, i32
  }
  func.func @transform_4(%arg0: i32) -> (i32, i32) {
    %c0_i32 = arith.constant 0 : i32
    %c0_i32_0 = arith.constant 0 : i32
    %c0_i32_1 = arith.constant 0 : i32
    return %c0_i32, %c0_i32_0 : i32, i32
  }
  func.func @transform_5(%arg0: i32) -> (i32, i32) {
    %c0_i32 = arith.constant 0 : i32
    %c0_i32_0 = arith.constant 0 : i32
    %c0_i32_1 = arith.constant 0 : i32
    return %c0_i32, %c0_i32_0 : i32, i32
  }
  func.func @transform_6(%arg0: i32) -> (i32, i32) {
    %c0_i32 = arith.constant 0 : i32
    %c0_i32_0 = arith.constant 0 : i32
    %c0_i32_1 = arith.constant 0 : i32
    return %c0_i32, %c0_i32_0 : i32, i32
  }
  func.func @transform_7(%arg0: i32) -> (i32, i32) {
    %c0_i32 = arith.constant 0 : i32
    %c0_i32_0 = arith.constant 0 : i32
    %c0_i32_1 = arith.constant 0 : i32
    return %c0_i32, %c0_i32_0 : i32, i32
  }
  func.func @transform_8(%arg0: i32) -> (i32, i32) {
    %c0_i32 = arith.constant 0 : i32
    %c0_i32_0 = arith.constant 0 : i32
    %c0_i32_1 = arith.constant 0 : i32
    return %c0_i32, %c0_i32_0 : i32, i32
  }
  func.func @transform_9(%arg0: i32) -> (i32, i32) {
    %c0_i32 = arith.constant 0 : i32
    %c0_i32_0 = arith.constant 0 : i32
    %c0_i32_1 = arith.constant 0 : i32
    return %c0_i32, %c0_i32_0 : i32, i32
  }
  func.func @transform_10(%arg0: i32) -> (i32, i32) {
    %c0_i32 = arith.constant 0 : i32
    %c0_i32_0 = arith.constant 0 : i32
    return %c0_i32, %arg0 : i32, i32
  }
}

</mosaic_0001>

<bundles_post_ra>
// kernel: tpu_custom_call.1
= control target key start
LH: loop header
LB: loop body
LE: loop exit
PB: predicated region body
PF: predicated region fallthrough
CT: control target
= control target key end

     0   :  { %15 = vsyncpa [#allocation3], 0  ;;  %s3326_s0 = inlined_call_operand.vmem [shape: f32[4,512], index: 0, kind: input, shape index: {}]   ;;  %s3327_s1 = inlined_call_operand.vmem [shape: f32[32,1], index: 1, kind: input, shape index: {}]   ;;  %s3328_s2 = inlined_call_operand.vmem [shape: f32[64,4], index: 2, kind: input, shape index: {}]   ;;  %s3329_s3 = inlined_call_operand.vmem [shape: f32[64,64], index: 3, kind: input, shape index: {}]   ;;  %s3330_s4 = inlined_call_operand.vmem [shape: f32[64,1], index: 4, kind: input, shape index: {}]   ;;  %s3331_s5 = inlined_call_operand.vmem [shape: f32[64,64], index: 5, kind: input, shape index: {}]   ;;  %s3332_s6 = inlined_call_operand.vmem [shape: f32[64,64], index: 6, kind: input, shape index: {}]   ;;  %s3333_s7 = inlined_call_operand.vmem [shape: f32[64,1], index: 7, kind: input, shape index: {}]   ;;  %s3334_s8 = inlined_call_operand.vmem [shape: f32[3,64], index: 8, kind: input, shape index: {}]   ;;  %s3335_s9 = inlined_call_operand.vmem [shape: f32[3,1], index: 9, kind: input, shape index: {}]   ;;  %s3336_s10 = inlined_call_operand.hbm [shape: f32[3,512], index: 10, kind: output, shape index: {}]  }
   0x1   :  { %17 = vsyncpa [#allocation3 + $0x1], 0  ;;  %s2696_s13 = smov 0   ;;  %s2698_s14 = smov 0  }
   0x2   :  { %s2700_s15 = smov 0   ;;  %s2702_s16 = smov 0  }
   0x3 LB: > { %s2717_s17 = sadd.s32 4294967295, %s2628_s16   ;;  %s2116_s18 = sadd.s32 4294967294, %s2628_s16   ;;  %s2628_s16 = sphi %s2702_s16, %s3348_s16   ;;  %s2624_s15 = sphi %s2700_s15, %s3347_s15   ;;  %s2620_s14 = sphi %s2698_s14, %s3346_s14   ;;  %s2616_s13 = sphi %s2696_s13, %s3345_s13  }
   0x4   : > { %s2721_s19 = sadd.s32 1, %s2628_s16   ;;  %s245_s20 = sadd.s32 1, %s2624_s15 }
   0x5   : > { %s242_s21 = ssub.s32 %s2628_s16, %s2721_s19  ;;  %p255_p0 = scmp.ne.s32.totalorder %s2624_s15, %s2620_s14 }
   0x6   : > { %p243_p1 = scmp.eq.s32.totalorder %s242_s21, 0  ;;  %p256_p2 = scmp.eq.s32.totalorder %s2717_s17, 3 }
   0x7   : > { %p261_p3 = scmp.ne.s32.totalorder %s2620_s14, %s2616_s13  ;;  %p262_p4 = scmp.eq.s32.totalorder %s2116_s18, 3 }
   0x8   : > { %s2732_s22 = scalar_select %p243_p1, %s2624_s15, %s245_s20  }
   0x9   : > { %p2734_p5 = por %p256_p2, %p255_p0  ;;  %p2738_p6 = por %p262_p4, %p261_p3 }
   0xa   : > { %p2119_p7 = scmp.ge.s32.totalorder %s2628_s16, 1  ;;  %p314_p8 = scmp.lt.s32.totalorder %s2628_s16, 5 }
   0xc   : > { %p315_p9 = pnand %p2119_p7, %p314_p8 }
   0xd   : > { %v358_v0 = vld [vmem:[%s3327_s1 + $0x10] sm:$0xff] (!%p315_p9)  ;;  %v356_v1 = vld [vmem:[%s3327_s1] sm:$0xff] (!%p315_p9)  ;;  %v2630_v2 = vmov (!%p315_p9), 0   ;;  %v359_v3 = vld [vmem:[%s3327_s1 + $0x18] sm:$0xff] (!%p315_p9)  ;;  %p351_p10 = scmp.lt.s32.totalorder (!%p315_p9), %s2717_s17, 3  ;;  %v380_v22 = vlaneseq (!%p315_p9)  ;;  %vm1387_vm0 = vcmask (!%p315_p9), 1043456  }
   0xe   : > { %318 = sbr.rel (%p315_p9) target bundleno = 1018 (0x3fa), region = 60  ;;  %2517 = vset.pattern.permute.xlu1 (!%p315_p9), %v2630_v2  ;;  %2516 = vset.pattern.permute.xlu0 (!%p315_p9), %v2630_v2  ;;  %v357_v4 = vld [vmem:[%s3327_s1 + $0x8] sm:$0xff] (!%p315_p9)  ;;  %v1496_v6 = vld [vmem:[%s3330_s4] sm:$0xff] (!%p315_p9)  ;;  %v1499_v7 = vld [vmem:[%s3330_s4 + $0x18] sm:$0xff] (!%p315_p9)  ;;  %v2631_v58 = vmov (!%p315_p9), 683565275  }
   0xf   : > { %372 = vperm.xlu1 (!%p315_p9), %2517, %v358_v0   ;;  %362 = vperm.xlu0 (!%p315_p9), %2516, %v356_v1   ;;  %v1497_v5 = vld [vmem:[%s3330_s4 + $0x8] sm:$0xff] (!%p315_p9)  ;;  %v1498_v8 = vld [vmem:[%s3330_s4 + $0x10] sm:$0xff] (!%p315_p9)  ;;  %v1500_v10 = vld [vmem:[%s3330_s4 + $0x20] sm:$0xff] (!%p315_p9)  ;;  %v381_v23 = vshrl.u32 (!%p315_p9), %v380_v22, 7  ;;  %v2632_v60 = vmov (!%p315_p9), 2475754826  }
  0x10   : > { %v1501_v9 = vld [vmem:[%s3330_s4 + $0x28] sm:$0xff] (!%p315_p9)  ;;  %v1503_v11 = vld [vmem:[%s3330_s4 + $0x38] sm:$0xff] (!%p315_p9)  ;;  %v1502_v12 = vld [vmem:[%s3330_s4 + $0x30] sm:$0xff] (!%p315_p9)  ;;  %v2633_v62 = vmov (!%p315_p9), 2131351028   ;;  %vm1362_vm13 = vcmask (!%p315_p9), 31744  }
  0x11   : > { %v1867_v13 = vld [vmem:[%s3333_s7 + $0x8] sm:$0xff] (!%p315_p9)  ;;  %v1866_v14 = vld [vmem:[%s3333_s7] sm:$0xff] (!%p315_p9)  ;;  %v1869_v15 = vld [vmem:[%s3333_s7 + $0x18] sm:$0xff] (!%p315_p9)  ;;  %v382_v24 = vsub.s32 (!%p315_p9), 3, %v381_v23  ;;  %v2634_v0 = vmov (!%p315_p9), 2102212464  }
  0x12   : > { %v1868_v16 = vld [vmem:[%s3333_s7 + $0x10] sm:$0xff] (!%p315_p9)  ;;  %v1871_v17 = vld [vmem:[%s3333_s7 + $0x28] sm:$0xff] (!%p315_p9)  ;;  %v1870_v18 = vld [vmem:[%s3333_s7 + $0x20] sm:$0xff] (!%p315_p9)  ;;  %v2635_v2 = vmov (!%p315_p9), 920167782   ;;  %s348_s28 = sand.u32 (!%p315_p9), 1, %s2620_s14  }
  0x13   : > { %377 = vperm.xlu1 (!%p315_p9), %2517, %v359_v3   ;;  %367 = vperm.xlu0 (!%p315_p9), %2516, %v357_v4   ;;  %v1873_v19 = vld [vmem:[%s3333_s7 + $0x38] sm:$0xff] (!%p315_p9)  ;;  %v1872_v20 = vld [vmem:[%s3333_s7 + $0x30] sm:$0xff] (!%p315_p9)  ;;  %v1963_v21 = vld [vmem:[%s3335_s9] sm:$0x7] (!%p315_p9)  ;;  %s2120_s29 = sshll.u32 (!%p315_p9), %s348_s28, 2  ;;  %s2189_s30 = sshll.u32 (!%p315_p9), %s2717_s17, 6 }
  0x14   : > { %s350_s11 = scalar_lea.vmem (!%p315_p9), [#allocation2], %s2120_s29  ;;  %s2044_s25 = scalar_lea.sflag (!%p315_p9), [#allocation3], %s348_s28 }
  0x15   : > { %s352_s20 = scalar_select %p351_p10, %s2717_s17, 3 }
  0x16   : > { %s2057_s12 = sshll.u32 %s350_s11, 4  ;;  %s2640_s17 = smov [#allocation2]   ;;  %s3286_s12 = int_to_ptr.vmem [resolvable:$true] %s2057_s12 }
  0x17   : > { %1511 = vperm.xlu1 %2517, %v1497_v5   ;;  %1506 = vperm.xlu0 %2516, %v1496_v6   ;;  %s2121_s21 = sshll.u32 %s352_s20, 2  ;;  %s2566_s26 = scalar_lea.vmem %s3286_s12, 64 }
  0x18   : > { %s354_s27 = scalar_lea.vmem %s3326_s0, %s2121_s21  ;;  %s3284_s21 = scalar_lea.hbm %s3336_s10, %s2189_s30 }
  0x19   : > { %v355_v25 = vld [vmem:[%s354_s27] sm:$0xf]  ;;  %p2567_p11 = scmp.ne.s32.totalorder %s3286_s12, %s2566_s26  ;;  %s2570_s27 = sshll.u32 %s2640_s17, 4  ;;  %s2571_s27 = int_to_ptr.vmem [resolvable:$false] %s2570_s27 }
  0x1a   : > { %2286 = vmatprep.subr.msk.mxu1 %vm1387_vm0, %v355_v25  ;;  %v2812_v26 = vrot.slane %v355_v25, %v382_v24  ;;  %s2572_s29 = scalar_lea.vmem %s2571_s27, 128  ;;  %p2573_p0 = scmp.lt.s32.totalorder %s3286_s12, %s2571_s27 }
  0x1b   : > { %1521 = vperm.xlu1 %2517, %v1499_v7   ;;  %1516 = vperm.xlu0 %2516, %v1498_v8   ;;  %p2568_p12 = pnand %p2567_p11, %p2734_p5  ;;  %p2574_p1 = scmp.lt.s32.totalorder %s2572_s29, %s2566_s26 }
  0x1c   : > { %2287 = vmatpush3.msk.msra.mxu1 %vm1387_vm0, %v355_v25 }
  0x1d   : > { %p2569_p13 = pneg %p2568_p12  ;;  %p2575_p2 = por %p2574_p1, %p2573_p0 }
  0x1f   : > { %1531 = vperm.xlu1 %2517, %v1501_v9   ;;  %1526 = vperm.xlu0 %2516, %v1500_v10   ;;  %p2576_p3 = pnand %p2575_p2, %p2569_p13 }
  0x23   : > { %1541 = vperm.xlu1 %2517, %v1503_v11   ;;  %1536 = vperm.xlu0 %2516, %v1502_v12   ;;  %v2636_v11 = vmov 1326507024  }
  0x27   : > { %1881 = vperm.xlu1 %2517, %v1867_v13   ;;  %1876 = vperm.xlu0 %2516, %v1866_v14  }
  0x2b   : > { %1891 = vperm.xlu1 %2517, %v1869_v15   ;;  %1886 = vperm.xlu0 %2516, %v1868_v16  }
  0x2f   : > { %1901 = vperm.xlu1 %2517, %v1871_v17   ;;  %1896 = vperm.xlu0 %2516, %v1870_v18  }
  0x33   : > { %1911 = vperm.xlu1 %2517, %v1873_v19   ;;  %1906 = vperm.xlu0 %2516, %v1872_v20  }
  0x37   : > { %1966 = vperm.xlu0 %2516, %v1963_v21  }
  0x8e   : > { %v373_v27 = vpop.permute.xlu1 %372  ;;  %v363_v28 = vpop.permute.xlu0 %362 }
  0x8f   : > { %v2815_v29 = vmul.f32 %v2812_v26, %v373_v27  ;;  %v2818_v30 = vmul.f32 %v2812_v26, %v363_v28 }
  0x91   : > { %v596_v31 = vand.u32 2147483647, %v2815_v29  ;;  %v599_v32 = vand.u32 2139095040, %v2815_v29  ;;  %v388_v33 = vand.u32 2147483647, %v2818_v30  ;;  %v391_v34 = vand.u32 2139095040, %v2818_v30 }
  0x92   : > { %v378_v35 = vpop.permute.xlu1 %377 }
  0x93   : > { %v600_v36 = vshrl.u32 %v599_v32, 23  ;;  %v2825_v37 = vmul.f32 %v2812_v26, %v378_v35  ;;  %v603_v38 = vand.u32 8388607, %v596_v31  ;;  %v392_v39 = vshrl.u32 %v391_v34, 23 }
  0x94   : > { %v395_v40 = vand.u32 8388607, %v388_v33 }
  0x95   : > { %v2130_v41 = vadd.s32 4294967169, %v600_v36  ;;  %v2122_v42 = vadd.s32 4294967169, %v392_v39  ;;  %v703_v43 = vand.u32 2139095040, %v2825_v37  ;;  %v604_v45 = vor.u32 8388608, %v603_v38 }
  0x96   : > { %v396_v46 = vor.u32 8388608, %v395_v40 }
  0x97   : > { %v606_v44 = vadd.s32 1, %v2130_v41  ;;  %v398_v47 = vadd.s32 1, %v2122_v42  ;;  %v704_v48 = vshrl.u32 %v703_v43, 23  ;;  %v2832_v54 = vshll.u32 %v604_v45, 8 }
  0x98   : > { %v2834_v56 = vshll.u32 %v396_v46, 8 }
  0x99   : > { %vm607_vm1 = vcmp.gt.s32.totalorder %v606_v44, 0  ;;  %vm399_vm2 = vcmp.gt.s32.totalorder %v398_v47, 0  ;;  %v2134_v50 = vadd.s32 4294967169, %v704_v48 }
  0x9a   : > { %v608_v49 = vsel %vm607_vm1, %v606_v44, 0  ;;  %v400_v52 = vsel %vm399_vm2, %v398_v47, 0 }
  0x9b   : > { %v610_v51 = vand.u32 31, %v608_v49  ;;  %v609_v53 = vshrl.u32 %v608_v49, 5  ;;  %v402_v55 = vand.u32 31, %v400_v52  ;;  %v2841_v4 = vshrl.u32 %v400_v52, 5 }
  0x9c   : > { %v2843_v5 = vadd.s32 1, %v2134_v50 }
  0x9d   : > { %v611_v57 = vsub.s32 32, %v610_v51  ;;  %v613_v59 = vshll.u32 %v2631_v58, %v610_v51  ;;  %v616_v61 = vshll.u32 %v2632_v60, %v610_v51  ;;  %v619_v63 = vshll.u32 %v2633_v62, %v610_v51 }
  0x9e   : > { %v622_v1 = vshll.u32 %v2634_v0, %v610_v51  ;;  %v625_v3 = vshll.u32 %v2635_v2, %v610_v51  ;;  %vm628_vm3 = vcmp.lt.s32.totalorder %v609_v53, 1  ;;  %vm629_vm4 = vcmp.lt.s32.totalorder %v609_v53, 2 }
  0x9f   : > { %v612_v6 = vshrl.u32 %v2631_v58, %v611_v57  ;;  %v614_v7 = vshrl.u32 %v2632_v60, %v611_v57  ;;  %v617_v8 = vshrl.u32 %v2633_v62, %v611_v57  ;;  %v620_v9 = vshrl.u32 %v2634_v0, %v611_v57 }
  0xa0   : > { %v623_v10 = vshrl.u32 %v2635_v2, %v611_v57  ;;  %v626_v12 = vshrl.u32 %v2636_v11, %v611_v57  ;;  %v403_v16 = vsub.s32 32, %v402_v55  ;;  %vm630_vm5 = vcmp.lt.s32.totalorder %v609_v53, 3 }
  0xa1   : > { %v615_v13 = vor.u32 %v614_v7, %v613_v59  ;;  %v618_v14 = vor.u32 %v617_v8, %v616_v61  ;;  %v621_v15 = vor.u32 %v620_v9, %v619_v63  ;;  %vm631_vm6 = vcmp.lt.s32.totalorder %v609_v53, 4 }
  0xa2   : > { %v624_v17 = vor.u32 %v623_v10, %v622_v1  ;;  %v627_v18 = vor.u32 %v626_v12, %v625_v3  ;;  %v405_v27 = vshll.u32 %v2631_v58, %v402_v55  ;;  %v406_v34 = vshrl.u32 %v2632_v60, %v403_v16 }
  0xa3   : > { %v632_v19 = vsel %vm628_vm3, %v612_v6, %v615_v13  ;;  %v633_v20 = vsel %vm631_vm6, %v621_v15, 2102212464  ;;  %v636_v21 = vsel %vm628_vm3, %v615_v13, %v618_v14  ;;  %v640_v22 = vsel %vm628_vm3, %v618_v14, %v621_v15  ;;  %v368_v13 = vpop.permute.xlu0 %367 }
  0xa4   : > { %v634_v23 = vsel %vm630_vm5, %v618_v14, %v633_v20  ;;  %v637_v24 = vsel %vm631_vm6, %v624_v17, 920167782  ;;  %v641_v25 = vsel %vm631_vm6, %v627_v18, 1326507024  ;;  %v408_v35 = vshll.u32 %v2632_v60, %v402_v55 }
  0xa5   : > { %v638_v28 = vsel %vm630_vm5, %v621_v15, %v637_v24  ;;  %v642_v32 = vsel %vm630_vm5, %v624_v17, %v641_v25  ;;  %v635_v36 = vsel %vm629_vm4, %v632_v19, %v634_v23  ;;  %v409_v40 = vshrl.u32 %v2633_v62, %v403_v16  ;;  %v1216_v25 = vld [vmem:[%s3328_s2] sm:$0xff] }
  0xa6   : > { %v639_v38 = vsel %vm629_vm4, %v636_v21, %v638_v28  ;;  %v643_v39 = vsel %vm629_vm4, %v640_v22, %v642_v32  ;;  %v407_v45 = vor.u32 %v406_v34, %v405_v27  ;;  %v411_v47 = vshll.u32 %v2633_v62, %v402_v55  ;;  %2288 = vmatprep.mubr.msk.f32.mxu1 %vm1362_vm13, %v1216_v25 }
  0xa7   : > { %v2859_v41 = vmul.u32.u64.low %v2832_v54, %v643_v39  ;;  %v2860_v42 = vmul.u32.u64.high %v2832_v54, %v643_v39, %v2859_v41  ;;  %v2863_v43 = vmul.u32.u64.low %v2832_v54, %v639_v38  ;;  %v2864_v44 = vmul.u32.u64.high %v2832_v54, %v639_v38, %v2863_v43 }
  0xa8   : > { %v410_v46 = vor.u32 %v409_v40, %v408_v35  ;;  %v412_v48 = vshrl.u32 %v2634_v0, %v403_v16  ;;  %v404_v49 = vshrl.u32 %v2631_v58, %v403_v16  ;;  %v414_v50 = vshll.u32 %v2634_v0, %v402_v55  ;;  %v1217_v35 = vld [vmem:[%s3328_s2 + $0x8] sm:$0xff] }
  0xa9   : > { %v415_v51 = vshrl.u32 %v2635_v2, %v403_v16  ;;  %v418_v52 = vshrl.u32 %v2636_v11, %v403_v16  ;;  %v651_v53 = vmul.u32 %v2832_v54, %v635_v36  ;;  %v417_v59 = vshll.u32 %v2635_v2, %v402_v55  ;;  %2289 = vmatmul.mubr.msk.f32.vlgmr.msra.gmra.mrb[0].mxu1 %vm1362_vm13, %v1217_v35 }
  0xaa   : > { %v413_v57 = vor.u32 %v412_v48, %v411_v47  ;;  %vm420_vm7 = vcmp.lt.s32.totalorder %v2841_v4, 1  ;;  %vm653_vm8 = vc.u32 %v2860_v42, %v2863_v43  ;;  %v654_v61 = vadd.s32 1, %v2864_v44  ;;  %v1220_v48 = vld [vmem:[%s3328_s2 + $0x20] sm:$0xff] }
  0xab   : > { %v416_v63 = vor.u32 %v415_v51, %v414_v50  ;;  %vm421_vm9 = vcmp.lt.s32.totalorder %v2841_v4, 2  ;;  %v419_v1 = vor.u32 %v418_v52, %v417_v59  ;;  %vm422_vm10 = vcmp.lt.s32.totalorder %v2841_v4, 3 }
  0xac   : > { %vm423_vm11 = vcmp.lt.s32.totalorder %v2841_v4, 4  ;;  %v428_v3 = vsel %vm420_vm7, %v407_v45, %v410_v46  ;;  %v655_v54 = vsel %vm653_vm8, %v654_v61, %v2864_v44  ;;  %v432_v7 = vsel %vm420_vm7, %v410_v46, %v413_v57  ;;  %v1219_v44 = vld [vmem:[%s3328_s2 + $0x18] sm:$0xff] }
  0xad   : > { %v425_v6 = vsel %vm423_vm11, %v413_v57, 2102212464  ;;  %v429_v55 = vsel %vm423_vm11, %v416_v63, 920167782  ;;  %v656_v8 = vadd.s32 %v655_v54, %v651_v53  ;;  %v424_v9 = vsel %vm420_vm7, %v404_v49, %v407_v45  ;;  %v1221_v54 = vld [vmem:[%s3328_s2 + $0x28] sm:$0xff] }
  0xae   : > { %v430_v10 = vsel %vm422_vm10, %v413_v57, %v429_v55  ;;  %v433_v12 = vsel %vm423_vm11, %v419_v1, 1326507024  ;;  %v426_v14 = vsel %vm422_vm10, %v410_v46, %v425_v6  ;;  %vm711_vm12 = vcmp.gt.s32.totalorder %v2843_v5, 0 }
  0xaf   : > { %v431_v15 = vsel %vm421_vm9, %v428_v3, %v430_v10  ;;  %v434_v16 = vsel %vm422_vm10, %v416_v63, %v433_v12  ;;  %v657_v17 = vadd.s32 536870912, %v656_v8  ;;  %v712_v23 = vsel %vm711_vm12, %v2843_v5, 0 }
  0xb0   : > { %v435_v18 = vsel %vm421_vm9, %v432_v7, %v434_v16  ;;  %v2889_v19 = vmul.u32.u64.low %v2834_v56, %v431_v15  ;;  %v2890_v20 = vmul.u32.u64.high %v2834_v56, %v431_v15, %v2889_v19  ;;  %v2899_v24 = vmul.f32 %v2812_v26, %v368_v13  ;;  %v1218_v26 = vld [vmem:[%s3328_s2 + $0x10] sm:$0xff] }
  0xb1   : > { %v2894_v21 = vmul.u32.u64.low %v2834_v56, %v435_v18  ;;  %v2895_v22 = vmul.u32.u64.high %v2834_v56, %v435_v18, %v2894_v21  ;;  %v2904_v27 = vshrl.u32 %v657_v17, 30  ;;  %v427_v28 = vsel %vm421_vm9, %v424_v9, %v426_v14  ;;  %2291 = vmatprep.mubr.msk.f32.mxu1 %vm1362_vm13, %v1218_v26  ;;  %v1222_v9 = vld [vmem:[%s3328_s2 + $0x30] sm:$0xff]  ;;  %v1223_v18 = vld [vmem:[%s3328_s2 + $0x38] sm:$0xff] }
  0xb2   : > { %v700_v32 = vand.u32 2147483647, %v2825_v37  ;;  %v714_v34 = vand.u32 31, %v712_v23  ;;  %v446_v36 = vadd.s32 1, %v2890_v20  ;;  %v443_v4 = vmul.u32 %v2834_v56, %v427_v28  ;;  %2292 = vmatmul.mubr.msk.f32.gmra.mrb[2].mxu1 %vm1362_vm13, %v1219_v44 }
  0xb3   : > { %v659_v5 = vshll.u32 %v2904_v27, 30  ;;  %vm445_vm14 = vc.u32 %v2895_v22, %v2889_v19  ;;  %v495_v41 = vand.u32 2139095040, %v2899_v24  ;;  %v713_v56 = vshrl.u32 %v712_v23, 5  ;;  %2294 = vmatprep.mubr.msk.f32.mxu1 %vm1362_vm13, %v1220_v48 }
  0xb4   : > { %v715_v38 = vsub.s32 32, %v714_v34  ;;  %v447_v39 = vsel %vm445_vm14, %v446_v36, %v2890_v20  ;;  %v707_v40 = vand.u32 8388607, %v700_v32  ;;  %v717_v50 = vshll.u32 %v2631_v58, %v714_v34 }
  0xb5   : > { %v448_v45 = vadd.s32 %v447_v39, %v443_v4  ;;  %v2935_v49 = vsub.s32 %v656_v8, %v659_v5  ;;  %v720_v51 = vshll.u32 %v2632_v60, %v714_v34  ;;  %v723_v57 = vshll.u32 %v2633_v62, %v714_v34 }
  0xb6   : > { %v718_v46 = vshrl.u32 %v2632_v60, %v715_v38  ;;  %v721_v47 = vshrl.u32 %v2633_v62, %v715_v38  ;;  %v724_v52 = vshrl.u32 %v2634_v0, %v715_v38  ;;  %v726_v59 = vshll.u32 %v2634_v0, %v714_v34  ;;  %2295 = vmatmul.mubr.msk.f32.gmra.mrb[4].mxu1 %vm1362_vm13, %v1221_v54 }
  0xb7   : > { %v449_v53 = vadd.s32 536870912, %v448_v45  ;;  %v727_v61 = vshrl.u32 %v2635_v2, %v715_v38  ;;  %v730_v3 = vshrl.u32 %v2636_v11, %v715_v38  ;;  %v729_v8 = vshll.u32 %v2635_v2, %v714_v34  ;;  %2297 = vmatprep.mubr.msk.f32.mxu1 %vm1362_vm13, %v1222_v9 }
  0xb8   : > { %v719_v63 = vor.u32 %v718_v46, %v717_v50  ;;  %v722_v1 = vor.u32 %v721_v47, %v720_v51  ;;  %v725_v55 = vor.u32 %v724_v52, %v723_v57  ;;  %v662_v10 = vsub.s32 0, %v2935_v49 }
  0xb9   : > { %v2949_v6 = vshrl.u32 %v449_v53, 30  ;;  %v728_v7 = vor.u32 %v727_v61, %v726_v59  ;;  %v708_v12 = vor.u32 8388608, %v707_v40  ;;  %v496_v13 = vshrl.u32 %v495_v41, 23 }
  0xba   : > { %v731_v15 = vor.u32 %v730_v3, %v729_v8  ;;  %vm732_vm15 = vcmp.lt.s32.totalorder %v713_v56, 1  ;;  %vm735_vm0 = vcmp.lt.s32.totalorder %v713_v56, 4  ;;  %vm734_vm1 = vcmp.lt.s32.totalorder %v713_v56, 3  ;;  %2298 = vmatmul.mubr.msk.f32.gmra.mrb[6].mxu1 %vm1362_vm13, %v1223_v18 }
  0xbb   : > { %v451_v14 = vshll.u32 %v2949_v6, 30  ;;  %v740_v16 = vsel %vm732_vm15, %v719_v63, %v722_v1  ;;  %v741_v17 = vsel %vm735_vm0, %v728_v7, 920167782  ;;  %vm733_vm2 = vcmp.lt.s32.totalorder %v713_v56, 2 }
  0xbc   : > { %v737_v21 = vsel %vm735_vm0, %v725_v55, 2102212464  ;;  %v742_v23 = vsel %vm734_vm1, %v725_v55, %v741_v17  ;;  %v2131_v25 = vmin.u32 %v662_v10, %v2935_v49  ;;  %v716_v28 = vshrl.u32 %v2631_v58, %v715_v38 }
  0xbd   : > { %v2964_v20 = vsub.s32 %v448_v45, %v451_v14  ;;  %v743_v34 = vsel %vm733_vm2, %v740_v16, %v742_v23  ;;  %v744_v35 = vsel %vm732_vm15, %v722_v1, %v725_v55  ;;  %v745_v5 = vsel %vm735_vm0, %v731_v15, 1326507024 }
  0xbe   : > { %v748_v36 = vshll.u32 %v708_v12, 8  ;;  %v2126_v4 = vadd.s32 4294967169, %v496_v13  ;;  %v736_v39 = vsel %vm732_vm15, %v716_v28, %v719_v63  ;;  %v738_v40 = vsel %vm734_vm1, %v722_v1, %v737_v21 }
  0xbf   : > { %v454_v26 = vsub.s32 0, %v2964_v20  ;;  %v746_v41 = vsel %vm734_vm1, %v728_v7, %v745_v5  ;;  %v664_v47 = vclz %v2131_v25  ;;  %v739_v51 = vsel %vm733_vm2, %v736_v39, %v738_v40 }
  0xc0   : > { %v747_v44 = vsel %vm733_vm2, %v744_v35, %v746_v41  ;;  %v2980_v45 = vmul.u32.u64.low %v748_v36, %v743_v34  ;;  %v2981_v46 = vmul.u32.u64.high %v748_v36, %v743_v34, %v2980_v45  ;;  %v502_v52 = vadd.s32 1, %v2126_v4 }
  0xc1   : > { %v2123_v38 = vmin.u32 %v454_v26, %v2964_v20  ;;  %v2984_v48 = vmul.u32.u64.low %v748_v36, %v747_v44  ;;  %v2985_v50 = vmul.u32.u64.high %v748_v36, %v747_v44, %v2984_v48  ;;  %v2132_v59 = vadd.s32 4294967294, %v664_v47 }
  0xc2   : > { %v758_v57 = vadd.s32 1, %v2981_v46  ;;  %vm503_vm3 = vcmp.gt.s32.totalorder %v502_v52, 0  ;;  %v755_v61 = vmul.u32 %v748_v36, %v739_v51  ;;  %v492_v63 = vand.u32 2147483647, %v2899_v24 }
  0xc3   : > { %v456_v53 = vclz %v2123_v38  ;;  %vm757_vm4 = vc.u32 %v2985_v50, %v2980_v45  ;;  %v504_v3 = vsel %vm503_vm3, %v502_v52, 0  ;;  %vm2133_vm5 = vcmp.lt.s32.totalorder %v2132_v59, 0 }
  0xc4   : > { %v759_v1 = vsel %vm757_vm4, %v758_v57, %v2981_v46  ;;  %v506_v7 = vand.u32 31, %v504_v3  ;;  %v499_v8 = vand.u32 8388607, %v492_v63  ;;  %v2997_v12 = vsel %vm2133_vm5, 0, %v2132_v59 }
  0xc5   : > { %v760_v54 = vadd.s32 %v759_v1, %v755_v61  ;;  %v2124_v55 = vadd.s32 4294967294, %v456_v53  ;;  %v672_v21 = vsub.s32 4294967266, %v2997_v12  ;;  %v505_v28 = vshrl.u32 %v504_v3, 5 }
  0xc6   : > { %v507_v9 = vsub.s32 32, %v506_v7  ;;  %v500_v15 = vor.u32 8388608, %v499_v8  ;;  %v509_v17 = vshll.u32 %v2631_v58, %v506_v7  ;;  %v512_v18 = vshll.u32 %v2632_v60, %v506_v7 }
  0xc7   : > { %v761_v56 = vadd.s32 536870912, %v760_v54  ;;  %vm2125_vm6 = vcmp.lt.s32.totalorder %v2124_v55, 0  ;;  %v515_v26 = vshll.u32 %v2633_v62, %v506_v7  ;;  %v518_v4 = vshll.u32 %v2634_v0, %v506_v7 }
  0xc8   : > { %v510_v13 = vshrl.u32 %v2632_v60, %v507_v9  ;;  %v513_v16 = vshrl.u32 %v2633_v62, %v507_v9  ;;  %v3005_v23 = vsel %vm2125_vm6, 0, %v2124_v55  ;;  %v516_v5 = vshrl.u32 %v2634_v0, %v507_v9 }
  0xc9   : > { %v2995_v10 = vshrl.u32 %v761_v56, 30  ;;  %v519_v39 = vshrl.u32 %v2635_v2, %v507_v9  ;;  %v540_v60 = vshll.u32 %v500_v15, 8  ;;  %v464_v40 = vsub.s32 4294967266, %v3005_v23 }
  0xca   : > { %v511_v34 = vor.u32 %v510_v13, %v509_v17  ;;  %v514_v35 = vor.u32 %v513_v16, %v512_v18  ;;  %v517_v41 = vor.u32 %v516_v5, %v515_v26  ;;  %v521_v38 = vshll.u32 %v2635_v2, %v506_v7 }
  0xcb   : > { %v763_v14 = vshll.u32 %v2995_v10, 30  ;;  %v522_v44 = vshrl.u32 %v2636_v11, %v507_v9  ;;  %v520_v47 = vor.u32 %v519_v39, %v518_v4  ;;  %vm524_vm7 = vcmp.lt.s32.totalorder %v505_v28, 1 }
  0xcc   : > { %vm527_vm8 = vcmp.lt.s32.totalorder %v505_v28, 4  ;;  %v508_v62 = vshrl.u32 %v2631_v58, %v507_v9  ;;  %v532_v0 = vsel %vm524_vm7, %v511_v34, %v514_v35  ;;  %vm526_vm9 = vcmp.lt.s32.totalorder %v505_v28, 3 }
  0xcd   : > { %v3007_v25 = vsub.s32 %v760_v54, %v763_v14  ;;  %v523_v48 = vor.u32 %v522_v44, %v521_v38  ;;  %v529_v51 = vsel %vm527_vm8, %v517_v41, 2102212464  ;;  %v533_v53 = vsel %vm527_vm8, %v520_v47, 920167782 }
  0xce   : > { %v536_v57 = vsel %vm524_vm7, %v514_v35, %v517_v41  ;;  %vm525_vm10 = vcmp.lt.s32.totalorder %v505_v28, 2  ;;  %v528_v59 = vsel %vm524_vm7, %v508_v62, %v511_v34  ;;  %v534_v61 = vsel %vm526_vm9, %v517_v41, %v533_v53  ;;  %v1224_v62 = vld [vmem:[%s3329_s3] sm:$0xff] }
  0xcf   : > { %v766_v36 = vsub.s32 0, %v3007_v25  ;;  %v537_v2 = vsel %vm527_vm8, %v523_v48, 1326507024  ;;  %v530_v11 = vsel %vm526_vm9, %v514_v35, %v529_v51  ;;  %v535_v3 = vsel %vm525_vm10, %v532_v0, %v534_v61 }
  0xd0   : > { %v538_v54 = vsel %vm526_vm9, %v520_v47, %v537_v2  ;;  %v673_v55 = vadd.s32 127, %v672_v21  ;;  %v3019_v56 = vmul.u32.u64.low %v540_v60, %v535_v3  ;;  %v3020_v8 = vmul.u32.u64.high %v540_v60, %v535_v3, %v3019_v56 }
  0xd1   : > { %v2135_v46 = vmin.u32 %v766_v36, %v3007_v25  ;;  %v539_v7 = vsel %vm525_vm10, %v536_v57, %v538_v54  ;;  %v668_v13 = vsub.s32 32, %v2997_v12  ;;  %v531_v15 = vsel %vm525_vm10, %v528_v59, %v530_v11 }
  0xd2   : > { %v3023_v58 = vmul.u32.u64.low %v540_v60, %v539_v7  ;;  %v3024_v9 = vmul.u32.u64.high %v540_v60, %v539_v7, %v3023_v58  ;;  %v465_v16 = vadd.s32 127, %v464_v40  ;;  %v652_v18 = vadd.s32 %v2863_v43, %v2860_v42 }
  0xd3   : > { %v768_v52 = vclz %v2135_v46  ;;  %v674_v28 = vshll.u32 %v673_v55, 23  ;;  %v550_v21 = vadd.s32 1, %v3020_v8  ;;  %v460_v34 = vsub.s32 32, %v3005_v23 }
  0xd4   : > { %v547_v26 = vmul.u32 %v540_v60, %v531_v15  ;;  %vm549_vm12 = vc.u32 %v3024_v9, %v3019_v56  ;;  %v670_v5 = vshrl.u32 %v652_v18, %v668_v13  ;;  %v444_v4 = vadd.s32 %v2889_v19, %v2895_v22 }
  0xd5   : > { %v2136_v1 = vadd.s32 4294967294, %v768_v52  ;;  %v551_v36 = vsel %vm549_vm12, %v550_v21, %v3020_v8  ;;  %v466_v39 = vshll.u32 %v465_v16, 23  ;;  %v669_v42 = vshll.u32 %v2935_v49, %v2997_v12 }
  0xd6   : > { %v552_v41 = vadd.s32 %v551_v36, %v547_v26  ;;  %v675_v43 = vor.u32 4788187, %v674_v28  ;;  %v462_v38 = vshrl.u32 %v444_v4, %v460_v34  ;;  %v756_v60 = vadd.s32 %v2980_v45, %v2985_v50 }
  0xd7   : > { %vm2137_vm11 = vcmp.lt.s32.totalorder %v2136_v1, 0  ;;  %v671_v47 = vor.u32 %v670_v5, %v669_v42  ;;  %v461_v19 = vshll.u32 %v2964_v20, %v3005_v23  ;;  %v467_v22 = vor.u32 4788187, %v466_v39 }
  0xd8   : > { %v771_v14 = vsel %vm2137_vm11, 0, %v2136_v1  ;;  %v553_v46 = vadd.s32 536870912, %v552_v41  ;;  %v676_v49 = vand.u32 2147483647, %v675_v43  ;;  %vm1232_vm13 = vcmask 523264  }
  0xd9   : > { %v776_v17 = vsub.s32 4294967266, %v771_v14  ;;  %v772_v40 = vsub.s32 32, %v771_v14  ;;  %v463_v12 = vor.u32 %v462_v38, %v461_v19  ;;  %v773_v0 = vshll.u32 %v3007_v25, %v771_v14  ;;  %2274 = vmatprep.mubr.msk.f32.mxu0 %vm1232_vm13, %v1224_v62 }
  0xda   : > { %v3045_v51 = vshrl.u32 %v553_v46, 30  ;;  %v678_v52 = vcvt.s32.f32 %v671_v47  ;;  %v468_v53 = vand.u32 2147483647, %v467_v22  ;;  %vm598_vm14 = vcmp.lt.s32.totalorder %v2815_v29, 0 }
  0xdb   : > { %v777_v35 = vadd.s32 127, %v776_v17  ;;  %v774_v48 = vshrl.u32 %v756_v60, %v772_v40  ;;  %v470_v20 = vcvt.s32.f32 %v463_v12  ;;  %vm3055_vm0 = vcmp.le.f32.partialorder %v596_v31, 0.7853982 }
  0xdc   : > { %v555_v50 = vshll.u32 %v3045_v51, 30  ;;  %v679_v61 = vmul.f32 %v678_v52, %v676_v49  ;;  %vm390_vm1 = vcmp.lt.s32.totalorder %v2818_v30, 0  ;;  %v548_v17 = vadd.s32 %v3019_v56, %v3024_v9 }
  0xdd   : > { %v778_v44 = vshll.u32 %v777_v35, 23  ;;  %v775_v57 = vor.u32 %v774_v48, %v773_v0  ;;  %v471_v1 = vmul.f32 %v470_v20, %v468_v53  ;;  %vm3069_vm2 = vcmp.le.f32.partialorder %v388_v33, 0.7853982 }
  0xde   : > { %v556_v59 = vsub.s32 %v552_v41, %v555_v50  ;;  %v680_v54 = vxor.u32 2147483648, %v679_v61  ;;  %vm702_vm3 = vcmp.lt.s32.totalorder %v2825_v37, 0  ;;  %vm3081_vm4 = vcmp.le.f32.partialorder %v700_v32, 0.7853982 }
  0xdf   : > { %v779_v45 = vor.u32 4788187, %v778_v44  ;;  %v782_v11 = vcvt.s32.f32 %v775_v57  ;;  %v472_v25 = vxor.u32 2147483648, %v471_v1  ;;  %v682_v33 = vsub.s32 4, %v2904_v27 }
  0xe0   : > { %v558_v2 = vsub.s32 0, %v556_v59  ;;  %v681_v58 = vsel %vm598_vm14, %v680_v54, %v679_v61  ;;  %v474_v39 = vsub.s32 4, %v2949_v6  ;;  %v786_v32 = vsub.s32 4, %v2995_v10 }
  0xe1   : > { %v780_v23 = vand.u32 2147483647, %v779_v45  ;;  %v473_v16 = vsel %vm390_vm1, %v472_v25, %v471_v1  ;;  %v684_v21 = vsel %vm3055_vm0, %v2815_v29, %v681_v58  ;;  %v683_v42 = vsel %vm598_vm14, %v682_v33, %v2904_v27 }
  0xe2   : > { %v2127_v3 = vmin.u32 %v558_v2, %v556_v59  ;;  %v476_v9 = vsel %vm3069_vm2, %v2818_v30, %v473_v16  ;;  %2518 = vcosq.f32 %v684_v21  ;;  %v475_v60 = vsel %vm390_vm1, %v474_v39, %v2949_v6 }
  0xe3   : > { %v783_v55 = vmul.f32 %v782_v11, %v780_v23  ;;  %2520 = vsinq.f32 %v684_v21  ;;  %v578_v46 = vsub.s32 4, %v3045_v51  ;;  %v3100_v47 = vsel %vm3055_vm0, 0, %v683_v42 }
  0xe4   : > { %v560_v7 = vclz %v2127_v3  ;;  %2522 = vcosq.f32 %v476_v9  ;;  %v787_v62 = vsel %vm702_vm3, %v786_v32, %v2995_v10  ;;  %v477_v27 = vsel %vm3069_vm2, 0, %v475_v60 }
  0xe5   : > { %v784_v13 = vxor.u32 2147483648, %v783_v55  ;;  %2524 = vsinq.f32 %v476_v9  ;;  %vm493_vm5 = vcmp.le.f32.partialorder %v492_v63, 0.7853982  ;;  %vm494_vm6 = vcmp.lt.s32.totalorder %v2899_v24, 0 }
  0xe6   : > { %v2128_v8 = vadd.s32 4294967294, %v560_v7  ;;  %v789_v22 = vsel %vm3081_vm4, 0, %v787_v62  ;;  %v579_v49 = vsel %vm494_vm6, %v578_v46, %v3045_v51  ;;  %v689_v12 = vadd.s32 3, %v3100_v47 }
  0xe7   : > { %v785_v34 = vsel %vm702_vm3, %v784_v13, %v783_v55  ;;  %v481_v45 = vadd.s32 3, %v477_v27  ;;  %v581_v52 = vsel %vm493_vm5, 0, %v579_v49  ;;  %v793_v53 = vadd.s32 3, %v789_v22 }
  0xe8   : > { %vm2129_vm15 = vcmp.lt.s32.totalorder %v2128_v8, 0  ;;  %v788_v40 = vsel %vm3081_vm4, %v2825_v37, %v785_v34  ;;  %v585_v2 = vadd.s32 3, %v581_v52  ;;  %v3128_v54 = vand.u32 3, %v477_v27 }
  0xe9   : > { %v563_v15 = vsel %vm2129_vm15, 0, %v2128_v8  ;;  %2526 = vcosq.f32 %v788_v40  ;;  %v482_v51 = vand.u32 3, %v481_v45  ;;  %v794_v3 = vand.u32 3, %v793_v53  ;;  %v1231_v53 = vld [vmem:[%s3329_s3 + $0x38] sm:$0xff] }
  0xea   : > { %v564_v18 = vsub.s32 32, %v563_v15  ;;  %v568_v28 = vsub.s32 4294967266, %v563_v15  ;;  %v565_v35 = vshll.u32 %v556_v59, %v563_v15  ;;  %2528 = vsinq.f32 %v788_v40 }
  0xeb   : > { %v690_v59 = vand.u32 3, %v689_v12  ;;  %vm480_vm9 = vweird.f32 %v2818_v30  ;;  %vm483_vm10 = vcmp.lt.s32.totalorder %v482_v51, 2  ;;  %vm484_vm11 = vcmp.eq.s32.totalorder %v482_v51, 0  ;;  %v1225_v30 = vld [vmem:[%s3329_s3 + $0x8] sm:$0xff] }
  0xec   : > { %v566_v26 = vshrl.u32 %v548_v17, %v564_v18  ;;  %v569_v56 = vadd.s32 127, %v568_v28  ;;  %v3110_v6 = vpop.eup %2518  ;;  %vm584_vm12 = vweird.f32 %v2899_v24  ;;  %vm792_vm14 = vweird.f32 %v2825_v37  ;;  %v1226_v37 = vld [vmem:[%s3329_s3 + $0x10] sm:$0xff] }
  0xed   : > { %v3116_v10 = vpop.eup %2520  ;;  %v696_v23 = vxor.u32 2147483648, %v3110_v6  ;;  %vm692_vm7 = vcmp.eq.s32.totalorder %v690_v59, 0  ;;  %vm695_vm8 = vcmp.eq.s32.totalorder %v690_v59, 2  ;;  %vm487_vm15 = vcmp.eq.s32.totalorder %v482_v51, 2 }
  0xee   : > { %v567_v36 = vor.u32 %v566_v26, %v565_v35  ;;  %v570_v4 = vshll.u32 %v569_v56, 23  ;;  %v3119_v50 = vpop.eup %2522  ;;  %v693_v20 = vxor.u32 2147483648, %v3116_v10  ;;  %v586_v58 = vand.u32 3, %v585_v2 }
  0xef   : > { %v2525_v63 = vpop.eup %2524  ;;  %v488_v11 = vxor.u32 2147483648, %v3119_v50  ;;  %v697_v8 = vsel %vm695_vm8, %v696_v23, %v3116_v10  ;;  %vm691_vm0 = vcmp.lt.s32.totalorder %v690_v59, 2  ;;  %v1000_v13 = vand.u32 3, %v581_v52  ;;  %v1230_v52 = vld [vmem:[%s3329_s3 + $0x30] sm:$0xff] }
  0xf0   : > { %v571_v41 = vor.u32 4788187, %v570_v4  ;;  %v574_v38 = vcvt.s32.f32 %v567_v36  ;;  %v485_v1 = vxor.u32 2147483648, %v2525_v63  ;;  %v694_v25 = vsel %vm692_vm7, %v3110_v6, %v693_v20 }
  0xf1   : > { %v489_v15 = vsel %vm487_vm15, %v488_v11, %v2525_v63  ;;  %vm688_vm1 = vweird.f32 %v2815_v29  ;;  %vm796_vm2 = vcmp.eq.s32.totalorder %v794_v3, 0  ;;  %vm799_vm3 = vcmp.eq.s32.totalorder %v794_v3, 2  ;;  %v1227_v29 = vld [vmem:[%s3329_s3 + $0x18] sm:$0xff] }
  0xf2   : > { %v572_v43 = vand.u32 2147483647, %v571_v41  ;;  %v486_v14 = vsel %vm484_vm11, %v3119_v50, %v485_v1  ;;  %v698_v17 = vsel %vm691_vm0, %v694_v25, %v697_v8  ;;  %vm899_vm4 = vcmp.eq.s32.totalorder %v3128_v54, 0  ;;  %v1605_v25 = vld [vmem:[%s3332_s6 + $0x28] sm:$0xff]  ;;  %v1606_v8 = vld [vmem:[%s3332_s6 + $0x30] sm:$0xff] }
  0xf3   : > { %v3121_v57 = vpop.eup %2526  ;;  %v1206_v34 = vand.u32 3, %v789_v22  ;;  %v490_v35 = vsel %vm483_vm10, %v486_v14, %v489_v15  ;;  %vm591_vm7 = vcmp.eq.s32.totalorder %v586_v58, 2  ;;  %vm1002_vm8 = vcmp.eq.s32.totalorder %v1000_v13, 0  ;;  %v1512_v14 = vpop.permute.xlu1 %1511 }
  0xf4   : > { %v575_v44 = vmul.f32 %v574_v38, %v572_v43  ;;  %v3123_v61 = vpop.eup %2528  ;;  %v800_v7 = vxor.u32 2147483648, %v3121_v57  ;;  %vm588_vm11 = vcmp.eq.s32.totalorder %v586_v58, 0  ;;  %vm1005_vm15 = vcmp.eq.s32.totalorder %v1000_v13, 2  ;;  %v1507_v15 = vpop.permute.xlu0 %1506 }
  0xf5   : > { %v797_v55 = vxor.u32 2147483648, %v3123_v61  ;;  %vm587_vm0 = vcmp.lt.s32.totalorder %v586_v58, 2  ;;  %v901_v39 = vsel %vm899_vm4, %v3119_v50, %v485_v1  ;;  %v1103_v41 = vand.u32 3, %v3100_v47  ;;  %v1228_v50 = vld [vmem:[%s3329_s3 + $0x20] sm:$0xff]  ;;  %v1607_v58 = vld [vmem:[%s3332_s6 + $0x38] sm:$0xff] }
  0xf6   : > { %v576_v19 = vxor.u32 2147483648, %v575_v44  ;;  %v801_v28 = vsel %vm799_vm3, %v800_v7, %v3123_v61  ;;  %v491_v32 = vsel %vm480_vm9, nan, %v490_v35  ;;  %vm1001_vm10 = vcmp.lt.s32.totalorder %v1000_v13, 2  ;;  %v1592_v13 = vld [vmem:[%s3331_s5] sm:$0xff] }
  0xf7   : > { %v798_v18 = vsel %vm796_vm2, %v3121_v57, %v797_v55  ;;  %vm1208_vm2 = vcmp.eq.s32.totalorder %v1206_v34, 0  ;;  %vm1211_vm3 = vcmp.eq.s32.totalorder %v1206_v34, 2  ;;  %vm898_vm4 = vcmp.lt.s32.totalorder %v3128_v54, 2 }
  0xf8   : > { %v577_v48 = vsel %vm494_vm6, %v576_v19, %v575_v44  ;;  %vm902_vm6 = vcmp.eq.s32.totalorder %v3128_v54, 2  ;;  %v699_v44 = vsel %vm688_vm1, nan, %v698_v17  ;;  %v1210_v46 = vsel %vm1208_vm2, %v3121_v57, %v797_v55  ;;  %v1602_v54 = vld [vmem:[%s3332_s6 + $0x10] sm:$0xff]  ;;  %v1603_v55 = vld [vmem:[%s3332_s6 + $0x18] sm:$0xff] }
  0xf9   : > { %v580_v0 = vsel %vm493_vm5, %v2899_v24, %v577_v48  ;;  %vm795_vm5 = vcmp.lt.s32.totalorder %v794_v3, 2  ;;  %v904_v40 = vsel %vm902_vm6, %v488_v11, %v2525_v63  ;;  %v1213_v47 = vsel %vm1211_vm3, %v800_v7, %v3123_v61  ;;  %v1229_v63 = vld [vmem:[%s3329_s3 + $0x28] sm:$0xff]  ;;  %v1600_v11 = vld [vmem:[%s3332_s6] sm:$0xff] }
  0xfa   : > { %2530 = vcosq.f32 %v580_v0  ;;  %v802_v9 = vsel %vm795_vm5, %v798_v18, %v801_v28  ;;  %v905_v27 = vsel %vm898_vm4, %v901_v39, %v904_v40  ;;  %vm1105_vm5 = vcmp.eq.s32.totalorder %v1103_v41, 0  ;;  %2316 = vmatprep.mubr.msk.f32.mxu1 %vm1232_vm13, %v1600_v11  ;;  %v1601_v3 = vld [vmem:[%s3332_s6 + $0x8] sm:$0xff]  ;;  %v1604_v7 = vld [vmem:[%s3332_s6 + $0x20] sm:$0xff]  ;;  %v1522_v28 = vpop.permute.xlu1 %1521 }
  0xfb   : > { %2532 = vsinq.f32 %v580_v0  ;;  %v803_v43 = vsel %vm792_vm14, nan, %v802_v9  ;;  %vm1108_vm6 = vcmp.eq.s32.totalorder %v1103_v41, 2  ;;  %v1107_v22 = vsel %vm1105_vm5, %v3110_v6, %v693_v20 }
  0xfc   : > { %v2379_v62 = vpack.c.bf16 %v803_v43, %v699_v44  ;;  %v1110_v48 = vsel %vm1108_vm6, %v696_v23, %v3116_v10  ;;  %v906_v12 = vsel %vm480_vm9, nan, %v905_v27  ;;  %vm2638_vm9 = vmmov 0  }
  0xfe   : > { %v1532_v39 = vpop.permute.xlu1 %1531 }
 0x104   : > { %v2531_v16 = vpop.eup %2530 }
 0x105   : > { %v2533_v21 = vpop.eup %2532  ;;  %v592_v31 = vxor.u32 2147483648, %v2531_v16 }
 0x106   : > { %v589_v26 = vxor.u32 2147483648, %v2533_v21 }
 0x107   : > { %v593_v56 = vsel %vm591_vm7, %v592_v31, %v2533_v21  ;;  %v1007_v36 = vsel %vm1005_vm15, %v592_v31, %v2533_v21  ;;  %vm1207_vm7 = vcmp.lt.s32.totalorder %v1206_v34, 2  ;;  %v1517_v31 = vpop.permute.xlu0 %1516 }
 0x108   : > { %v590_v5 = vsel %vm588_vm11, %v2531_v16, %v589_v26  ;;  %v1004_v33 = vsel %vm1002_vm8, %v2531_v16, %v589_v26  ;;  %v1214_v49 = vsel %vm1207_vm7, %v1210_v46, %v1213_v47  ;;  %vm1104_vm8 = vcmp.lt.s32.totalorder %v1103_v41, 2 }
 0x109   : > { %v594_v4 = vsel %vm587_vm0, %v590_v5, %v593_v56  ;;  %v1008_v60 = vsel %vm1001_vm10, %v1004_v33, %v1007_v36  ;;  %v1111_v45 = vsel %vm1104_vm8, %v1107_v22, %v1110_v48  ;;  %v1215_v24 = vsel %vm792_vm14, nan, %v1214_v49  ;;  %v1542_v48 = vpop.permute.xlu1 %1541 }
 0x10a   : > { %v595_v42 = vsel %vm584_vm12, nan, %v594_v4  ;;  %v1009_v19 = vsel %vm584_vm12, nan, %v1008_v60  ;;  %v1112_v6 = vsel %vm688_vm1, nan, %v1111_v45 }
 0x10b   : > { %v2375_v38 = vpack.c.bf16 %v595_v42, %v491_v32  ;;  %v2383_v0 = vpack.c.bf16 %v1009_v19, %v906_v12  ;;  %v2387_v10 = vpack.c.bf16 %v1215_v24, %v1112_v6  ;;  %v1527_v32 = vpop.permute.xlu0 %1526 }
 0x10d   : > { %2376 = vmatprep.subr.bf16.mxu0 %v2375_v38  ;;  %2392 = vmatprep.subr.bf16.mxu1 %v2375_v38 }
 0x10e   : > { %2378 = vmatpush3.bf16.msra.mxu0 %v2375_v38  ;;  %2394 = vmatpush3.bf16.msra.mxu1 %v2375_v38 }
 0x10f   : > { %2380 = vmatprep.subr.bf16.mxu0 %v2379_v62  ;;  %2396 = vmatprep.subr.bf16.mxu1 %v2379_v62 }
 0x112   : > { %2382 = vmatpush3.bf16.msra.mxu0 %v2379_v62  ;;  %2398 = vmatpush3.bf16.msra.mxu1 %v2379_v62 }
 0x113   : > { %2384 = vmatprep.subr.bf16.mxu0 %v2383_v0  ;;  %2400 = vmatprep.subr.bf16.mxu1 %v2383_v0 }
 0x116   : > { %2386 = vmatpush3.bf16.msra.mxu0 %v2383_v0  ;;  %2402 = vmatpush3.bf16.msra.mxu1 %v2383_v0  ;;  %v1537_v0 = vpop.permute.xlu0 %1536 }
 0x117   : > { %2388 = vmatprep.subr.bf16.mxu0 %v2387_v10  ;;  %2404 = vmatprep.subr.bf16.mxu1 %v2387_v10 }
 0x11a   : > { %2390 = vmatpush3.bf16.msra.mxu0 %v2387_v10  ;;  %2406 = vmatpush3.bf16.msra.mxu1 %v2387_v10 }
 0x11d   : > { %2275 = vmatmul.mubr.msk.f32.vlgmr.msra.gmra.mrb[0].mxu0 %vm1232_vm13, %v1225_v30  ;;  %2317 = vmatmul.mubr.msk.f32.vlgmr.msra.gmra.mrb[8].mxu1 %vm1232_vm13, %v1601_v3 }
 0x11e   : > { %2277 = vmatprep.mubr.msk.f32.mxu0 %vm1232_vm13, %v1226_v37  ;;  %2319 = vmatprep.mubr.msk.f32.mxu1 %vm1232_vm13, %v1602_v54 }
 0x121   : > { %2278 = vmatmul.mubr.msk.f32.gmra.mrb[2].mxu0 %vm1232_vm13, %v1227_v29  ;;  %2320 = vmatmul.mubr.msk.f32.gmra.mrb[10].mxu1 %vm1232_vm13, %v1603_v55 }
 0x122   : > { %2280 = vmatprep.mubr.msk.f32.mxu0 %vm1232_vm13, %v1228_v50  ;;  %2322 = vmatprep.mubr.msk.f32.mxu1 %vm1232_vm13, %v1604_v7 }
 0x125   : > { %2281 = vmatmul.mubr.msk.f32.gmra.mrb[4].mxu0 %vm1232_vm13, %v1229_v63  ;;  %2323 = vmatmul.mubr.msk.f32.gmra.mrb[12].mxu1 %vm1232_vm13, %v1605_v25 }
 0x126   : > { %2283 = vmatprep.mubr.msk.f32.mxu0 %vm1232_vm13, %v1230_v52  ;;  %2325 = vmatprep.mubr.msk.f32.mxu1 %vm1232_vm13, %v1606_v8 }
 0x129   : > { %2284 = vmatmul.mubr.msk.f32.gmra.mrb[6].mxu0 %vm1232_vm13, %v1231_v53  ;;  %2326 = vmatmul.mubr.msk.f32.gmra.mrb[14].mxu1 %vm1232_vm13, %v1607_v58 }
 0x12a   : > { %2344 = vmatprep.mubr.msk.f32.mxu1 %vm1232_vm13, %v1592_v13 }
 0x17c   : > { %v2290_v57 = vpop.f32.mrb[0].mxu1 }
 0x17d   : > { %v1457_v59 = vpop.f32.mrb[1].mxu1 }
 0x185   : > { %v2293_v61 = vpop.f32.mrb[2].mxu1 }
 0x186   : > { %v1467_v51 = vpop.f32.mrb[3].mxu1 }
 0x189   : > { %v2296_v20 = vpop.f32.mrb[4].mxu1 }
 0x18a   : > { %v1477_v23 = vpop.f32.mrb[5].mxu1 }
 0x18d   : > { %v2299_v2 = vpop.f32.mrb[6].mxu1 }
 0x18e   : > { %v1487_v1 = vpop.f32.mrb[7].mxu1 }
 0x1f0   : > { %v2276_v16 = vpop.f32.mrb[0].mxu0 }
 0x1f1   : > { %v1463_v17 = vadd.f32 %v2290_v57, %v2276_v16  ;;  %v1323_v18 = vpop.f32.mrb[1].mxu0 }
 0x1f2   : > { %v1458_v21 = vadd.f32 %v1457_v59, %v1323_v18 }
 0x1f3   : > { %v1545_v34 = vadd.f32 %v1512_v14, %v1463_v17 }
 0x1f4   : > { %v1544_v35 = vadd.f32 %v1507_v15, %v1458_v21  ;;  %v2279_v26 = vpop.f32.mrb[2].mxu0 }
 0x1f5   : > { %v1553_v56 = vmul.f32 0.5, %v1545_v34  ;;  %v1473_v9 = vadd.f32 %v2293_v61, %v2279_v26  ;;  %v1333_v5 = vpop.f32.mrb[3].mxu0 }
 0x1f6   : > { %v1552_v33 = vmul.f32 0.5, %v1544_v35  ;;  %v1468_v36 = vadd.f32 %v1467_v51, %v1333_v5  ;;  %v1594_v5 = vld [vmem:[%s3331_s5 + $0x10] sm:$0xff] }
 0x1f7   : > { %2534 = vtanh.f32 %v1553_v56  ;;  %v1547_v4 = vadd.f32 %v1522_v28, %v1473_v9  ;;  %v1593_v9 = vld [vmem:[%s3331_s5 + $0x8] sm:$0xff] }
 0x1f8   : > { %2536 = vtanh.f32 %v1552_v33  ;;  %v1546_v40 = vadd.f32 %v1517_v31, %v1468_v36  ;;  %v2282_v41 = vpop.f32.mrb[4].mxu0  ;;  %v1595_v33 = vld [vmem:[%s3331_s5 + $0x18] sm:$0xff]  ;;  %v1596_v36 = vld [vmem:[%s3331_s5 + $0x20] sm:$0xff] }
 0x1f9   : > { %v1555_v42 = vmul.f32 0.5, %v1547_v4  ;;  %v1483_v43 = vadd.f32 %v2296_v20, %v2282_v41  ;;  %v1343_v38 = vpop.f32.mrb[5].mxu0  ;;  %v2637_v41 = vmov 0.0|0.0  }
 0x1fa   : > { %v1554_v60 = vmul.f32 0.5, %v1546_v40  ;;  %v1478_v44 = vadd.f32 %v1477_v23, %v1343_v38  ;;  %2423 = vmatprep.subr.bf16.mxu0 %v2637_v41 }
 0x1fb   : > { %2538 = vtanh.f32 %v1555_v42  ;;  %v1549_v46 = vadd.f32 %v1532_v39, %v1483_v43  ;;  %v1598_v39 = vld [vmem:[%s3331_s5 + $0x30] sm:$0xff]  ;;  %v1882_v42 = vpop.permute.xlu1 %1881  ;;  %v1877_v43 = vpop.permute.xlu0 %1876 }
 0x1fc   : > { %2540 = vtanh.f32 %v1554_v60  ;;  %v1548_v47 = vadd.f32 %v1527_v32, %v1478_v44  ;;  %v2285_v62 = vpop.f32.mrb[6].mxu0  ;;  %v2639_v32 = vmov 0.0  }
 0x1fd   : > { %v1557_v27 = vmul.f32 0.5, %v1549_v46  ;;  %v1493_v19 = vadd.f32 %v2299_v2, %v2285_v62  ;;  %v1353_v22 = vpop.f32.mrb[7].mxu0  ;;  %2372 = vmatprep.mubr.msk.f32.mxu0 %vm2638_vm9, %v2639_v32 }
 0x1fe   : > { %v1556_v49 = vmul.f32 0.5, %v1548_v47  ;;  %v1488_v12 = vadd.f32 %v1487_v1, %v1353_v22 }
 0x1ff   : > { %2542 = vtanh.f32 %v1557_v27  ;;  %v1551_v45 = vadd.f32 %v1542_v48, %v1493_v19  ;;  %v1892_v38 = vpop.permute.xlu1 %1891  ;;  %v1887_v44 = vpop.permute.xlu0 %1886 }
 0x200   : > { %2544 = vtanh.f32 %v1556_v49  ;;  %v1550_v24 = vadd.f32 %v1537_v0, %v1488_v12 }
 0x201   : > { %v2535_v6 = vpop.eup %2534  ;;  %v1559_v10 = vmul.f32 0.5, %v1551_v45 }
 0x202   : > { %v2537_v30 = vpop.eup %2536  ;;  %v1569_v37 = vmul.f32 0.5, %v2535_v6  ;;  %v1558_v29 = vmul.f32 0.5, %v1550_v24 }
 0x203   : > { %v1568_v50 = vmul.f32 0.5, %v2537_v30  ;;  %2546 = vtanh.f32 %v1559_v10  ;;  %v1902_v12 = vpop.permute.xlu1 %1901 }
 0x204   : > { %v1577_v63 = vadd.f32 0.5, %v1569_v37  ;;  %2548 = vtanh.f32 %v1558_v29 }
 0x205   : > { %v2539_v52 = vpop.eup %2538  ;;  %v1576_v53 = vadd.f32 0.5, %v1568_v50 }
 0x206   : > { %v2541_v57 = vpop.eup %2540  ;;  %v1585_v59 = vmul.f32 %v1577_v63, %v1545_v34  ;;  %v1571_v61 = vmul.f32 0.5, %v2539_v52 }
 0x207   : > { %v1584_v51 = vmul.f32 %v1576_v53, %v1544_v35  ;;  %v1570_v20 = vmul.f32 0.5, %v2541_v57  ;;  %v1912_v63 = vpop.permute.xlu1 %1911 }
 0x208   : > { %v1579_v23 = vadd.f32 0.5, %v1571_v61 }
 0x209   : > { %v2543_v2 = vpop.eup %2542  ;;  %v1578_v1 = vadd.f32 0.5, %v1570_v20  ;;  %v2407_v11 = vpack.c.bf16 %v1585_v59, %v1584_v51 }
 0x20a   : > { %v2545_v3 = vpop.eup %2544  ;;  %v1587_v54 = vmul.f32 %v1579_v23, %v1547_v4  ;;  %v1573_v55 = vmul.f32 0.5, %v2543_v2  ;;  %v1597_v4 = vld [vmem:[%s3331_s5 + $0x28] sm:$0xff] }
 0x20b   : > { %v1586_v7 = vmul.f32 %v1578_v1, %v1546_v40  ;;  %v1572_v25 = vmul.f32 0.5, %v2545_v3  ;;  %2408 = vmatprep.subr.bf16.mxu1 %v2407_v11  ;;  %v1599_v40 = vld [vmem:[%s3331_s5 + $0x38] sm:$0xff] }
 0x20c   : > { %v1581_v8 = vadd.f32 0.5, %v1573_v55  ;;  %2410 = vmatpush3.bf16.msra.mxu1 %v2407_v11 }
 0x20d   : > { %v2547_v58 = vpop.eup %2546  ;;  %v1580_v13 = vadd.f32 0.5, %v1572_v25  ;;  %v2411_v14 = vpack.c.bf16 %v1587_v54, %v1586_v7 }
 0x20e   : > { %v2549_v15 = vpop.eup %2548  ;;  %v1589_v16 = vmul.f32 %v1581_v8, %v1549_v46  ;;  %v1575_v17 = vmul.f32 0.5, %v2547_v58 }
 0x20f   : > { %v1588_v18 = vmul.f32 %v1580_v13, %v1548_v47  ;;  %v1574_v28 = vmul.f32 0.5, %v2549_v15  ;;  %2412 = vmatprep.subr.bf16.mxu1 %v2411_v14 }
 0x210   : > { %v1583_v21 = vadd.f32 0.5, %v1575_v17  ;;  %2414 = vmatpush3.bf16.msra.mxu1 %v2411_v14 }
 0x211   : > { %v1582_v31 = vadd.f32 0.5, %v1574_v28  ;;  %v2415_v34 = vpack.c.bf16 %v1589_v16, %v1588_v18 }
 0x212   : > { %v1591_v35 = vmul.f32 %v1583_v21, %v1551_v45  ;;  %v1897_v45 = vpop.permute.xlu0 %1896 }
 0x213   : > { %v1590_v26 = vmul.f32 %v1582_v31, %v1550_v24  ;;  %2416 = vmatprep.subr.bf16.mxu1 %v2415_v34 }
 0x214   : > { %2418 = vmatpush3.bf16.msra.mxu1 %v2415_v34 }
 0x215   : > { %v2419_v56 = vpack.c.bf16 %v1591_v35, %v1590_v26 }
 0x216   : > { %v1907_v57 = vpop.permute.xlu0 %1906 }
 0x217   : > { %2420 = vmatprep.subr.bf16.mxu1 %v2419_v56 }
 0x218   : > { %2422 = vmatpush3.bf16.msra.mxu1 %v2419_v56 }
 0x21b   : > { %2345 = vmatmul.mubr.msk.f32.vlgmr.msra.gmra.mrb[8].mxu1 %vm1232_vm13, %v1593_v9 }
 0x21c   : > { %2347 = vmatprep.mubr.msk.f32.mxu1 %vm1232_vm13, %v1594_v5 }
 0x21f   : > { %2348 = vmatmul.mubr.msk.f32.gmra.mrb[10].mxu1 %vm1232_vm13, %v1595_v33 }
 0x220   : > { %2350 = vmatprep.mubr.msk.f32.mxu1 %vm1232_vm13, %v1596_v36 }
 0x223   : > { %2351 = vmatmul.mubr.msk.f32.gmra.mrb[12].mxu1 %vm1232_vm13, %v1597_v4 }
 0x224   : > { %2353 = vmatprep.mubr.msk.f32.mxu1 %vm1232_vm13, %v1598_v39 }
 0x227   : > { %2354 = vmatmul.mubr.msk.f32.gmra.mrb[14].mxu1 %vm1232_vm13, %v1599_v40 }
 0x2ee   : > { %v2346_v60 = vpop.f32.mrb[8].mxu1 }
 0x2ef   : > { %v1915_v46 = vadd.f32 %v2346_v60, %v1882_v42  ;;  %v1827_v47 = vpop.f32.mrb[9].mxu1 }
 0x2f0   : > { %v1914_v62 = vadd.f32 %v1877_v43, %v1827_v47  ;;  %v1967_v47 = vpop.permute.xlu0 %1966 }
 0x2f1   : > { %v1923_v27 = vmul.f32 0.5, %v1915_v46 }
 0x2f2   : > { %v1922_v19 = vmul.f32 0.5, %v1914_v62  ;;  %v2349_v22 = vpop.f32.mrb[10].mxu1 }
 0x2f3   : > { %2550 = vtanh.f32 %v1923_v27  ;;  %v1917_v48 = vadd.f32 %v2349_v22, %v1892_v38  ;;  %v1837_v49 = vpop.f32.mrb[11].mxu1 }
 0x2f4   : > { %2552 = vtanh.f32 %v1922_v19  ;;  %v1916_v0 = vadd.f32 %v1887_v44, %v1837_v49 }
 0x2f5   : > { %v1925_v24 = vmul.f32 0.5, %v1917_v48 }
 0x2f6   : > { %v1924_v6 = vmul.f32 0.5, %v1916_v0  ;;  %v2352_v10 = vpop.f32.mrb[12].mxu1 }
 0x2f7   : > { %2554 = vtanh.f32 %v1925_v24  ;;  %v1919_v30 = vadd.f32 %v2352_v10, %v1902_v12  ;;  %v1847_v37 = vpop.f32.mrb[13].mxu1 }
 0x2f8   : > { %2556 = vtanh.f32 %v1924_v6  ;;  %v1918_v29 = vadd.f32 %v1897_v45, %v1847_v37 }
 0x2f9   : > { %v1927_v50 = vmul.f32 0.5, %v1919_v30 }
 0x2fa   : > { %v1926_v52 = vmul.f32 0.5, %v1918_v29  ;;  %v2355_v53 = vpop.f32.mrb[14].mxu1 }
 0x2fb   : > { %2558 = vtanh.f32 %v1927_v50  ;;  %v1921_v59 = vadd.f32 %v2355_v53, %v1912_v63  ;;  %v1857_v61 = vpop.f32.mrb[15].mxu1 }
 0x2fc   : > { %2560 = vtanh.f32 %v1926_v52  ;;  %v1920_v51 = vadd.f32 %v1907_v57, %v1857_v61 }
 0x2fd   : > { %v2551_v20 = vpop.eup %2550  ;;  %v1929_v23 = vmul.f32 0.5, %v1921_v59 }
 0x2fe   : > { %v2553_v2 = vpop.eup %2552  ;;  %v1939_v1 = vmul.f32 0.5, %v2551_v20  ;;  %v1928_v11 = vmul.f32 0.5, %v1920_v51 }
 0x2ff   : > { %v1938_v3 = vmul.f32 0.5, %v2553_v2  ;;  %2562 = vtanh.f32 %v1929_v23 }
 0x300   : > { %v1947_v54 = vadd.f32 0.5, %v1939_v1  ;;  %2564 = vtanh.f32 %v1928_v11 }
 0x301   : > { %v2555_v55 = vpop.eup %2554  ;;  %v1946_v7 = vadd.f32 0.5, %v1938_v3 }
 0x302   : > { %v2557_v25 = vpop.eup %2556  ;;  %v1955_v8 = vmul.f32 %v1947_v54, %v1915_v46  ;;  %v1941_v58 = vmul.f32 0.5, %v2555_v55  ;;  %v1962_v46 = vld [vmem:[%s3334_s8] sm:$0x7] }
 0x303   : > { %v1954_v13 = vmul.f32 %v1946_v7, %v1914_v62  ;;  %v1940_v14 = vmul.f32 0.5, %v2557_v25 }
 0x304   : > { %v1949_v15 = vadd.f32 0.5, %v1941_v58 }
 0x305   : > { %v2559_v16 = vpop.eup %2558  ;;  %v2424_v17 = vpack.c.bf16 %v1955_v8, %v1954_v13  ;;  %v1948_v18 = vadd.f32 0.5, %v1940_v14 }
 0x306   : > { %v2561_v28 = vpop.eup %2560  ;;  %v1957_v21 = vmul.f32 %v1949_v15, %v1917_v48  ;;  %v1943_v31 = vmul.f32 0.5, %v2559_v16 }
 0x307   : > { %v1956_v34 = vmul.f32 %v1948_v18, %v1916_v0  ;;  %v1942_v35 = vmul.f32 0.5, %v2561_v28  ;;  %2425 = vmatpush3.bf16.msra.mxu0 %v2424_v17 }
 0x308   : > { %v1951_v26 = vadd.f32 0.5, %v1943_v31  ;;  %2426 = vmatprep.subr.bf16.mxu0 %v2637_v41 }
 0x309   : > { %v2563_v56 = vpop.eup %2562  ;;  %v2427_v9 = vpack.c.bf16 %v1957_v21, %v1956_v34  ;;  %v1950_v5 = vadd.f32 0.5, %v1942_v35 }
 0x30a   : > { %v2565_v33 = vpop.eup %2564  ;;  %v1959_v36 = vmul.f32 %v1951_v26, %v1919_v30  ;;  %v1945_v4 = vmul.f32 0.5, %v2563_v56 }
 0x30b   : > { %v1958_v39 = vmul.f32 %v1950_v5, %v1918_v29  ;;  %v1944_v40 = vmul.f32 0.5, %v2565_v33  ;;  %2428 = vmatpush3.bf16.msra.mxu0 %v2427_v9 }
 0x30c   : > { %v1953_v32 = vadd.f32 0.5, %v1945_v4  ;;  %2429 = vmatprep.subr.bf16.mxu0 %v2637_v41 }
 0x30d   : > { %v2430_v42 = vpack.c.bf16 %v1959_v36, %v1958_v39  ;;  %v1952_v43 = vadd.f32 0.5, %v1944_v40 }
 0x30e   : > { %v1961_v38 = vmul.f32 %v1953_v32, %v1921_v59 }
 0x30f   : > { %v1960_v60 = vmul.f32 %v1952_v43, %v1920_v51  ;;  %2431 = vmatpush3.bf16.msra.mxu0 %v2430_v42 }
 0x310   : > { %2432 = vmatprep.subr.bf16.mxu0 %v2637_v41 }
 0x311   : > { %v2433_v44 = vpack.c.bf16 %v1961_v38, %v1960_v60 }
 0x313   : > { %2434 = vmatpush3.bf16.msra.mxu0 %v2433_v44 }
 0x316   : > { %2373 = vmatmul.mubr.msk.f32.vlgmr.msra.gmra.mrb[8].mxu0 %vm1232_vm13, %v1962_v46 }
 0x3e9   : > { %v2038_v62 = vpop.f32.mrb[8].mxu0 }
 0x3ea   : > { %v2039_v27 = vadd.f32 %v2038_v62, %v1967_v47  ;;  %v2374_v19 = vpop.f32.mrb[9].mxu0 }
 0x3ec   : > { %2042 = vst [vmem:[%s350_s11] sm:$0x7] %v2039_v27 }
 0x3ed   : > { %2579 = shalt.err (!%p2576_p3)
}
 0x3ee   : > { %s2580_s28 = scalar_lea.hbm %s3284_s21, 64  ;;  %s2584_s18 = scalar_lea.hbm %s3336_s10, 256 }
 0x3ef   : > { %p2581_p4 = scmp.ne.s32.totalorder %s3284_s21, %s2580_s28  ;;  %p2585_p9 = scmp.lt.u32.totalorder %s3284_s21, %s3336_s10 }
 0x3f0   : > { %p2586_p10 = scmp.lt.u32.totalorder %s2584_s18, %s2580_s28  ;;  %p2588_p12 = scmp.lt.u32.totalorder %s2580_s28, %s3284_s21 }
 0x3f1   : > { %p2582_p7 = pnand %p2581_p4, %p2734_p5 }
 0x3f2   : > { %p2587_p11 = por %p2586_p10, %p2585_p9 }
 0x3f3   : > { %p2583_p8 = pneg %p2582_p7 }
 0x3f4   : > { %p2589_p13 = por %p2588_p12, %p2587_p11 }
 0x3f6   : > { %p2590_p0 = pnand %p2589_p13, %p2583_p8 }
 0x3f8   : > { %2593 = shalt.err (!%p2590_p0)
}
 0x3f9   : > { %2467 = dma.vmem_to_hbm [thread:$0]  (%p2734_p5), %s3286_s12, 64, %s3284_s21, %s2044_s25  }
 0x3fa PF: > { %p2473_p1 = scmp.ge.s32.totalorder %s2628_s16, 2  ;;  %s2069_s26 = sand.u32 1, %s2616_s13  }
 0x3fb   : > { %s2070_s27 = scalar_lea.sflag [#allocation3], %s2069_s26 }
 0x3fc   : > { %p2470_p2 = pnand %p2473_p1, %p2738_p6 }
 0x3fe   : > { %2611 = dma.done.wait (!%p2470_p2), %s2070_s27, 64  }
 0x3ff   : > { %2613 = vsyncadd (!%p2470_p2), %s2070_s27, 4294967232  ;;  %p20_p3 = scmp.ge.s32.totalorder %s2721_s19, 6   ;;  %s3345_s13 = smov %s2620_s14 }
 0x400   : > { %s3346_s14 = smov %s2624_s15  ;;  %s3347_s15 = smov %s2732_s22 }
 0x401   : > { %s3348_s16 = smov %s2721_s19  ;;  %22 = sbr.rel (!%p20_p3) target bundleno = 3 (0x3), region = 95 }
 0x408   :  { %2075 = vsyncpa [#allocation3], 1 }
 0x409   :  { %2077 = vsyncpa [#allocation3 + $0x1], 1 }

</bundles_post_ra>
